<compile_context>
chip_gen: v7x
topology: tpu7x:2x2x1
jax: 0.10.0
libtpu: 0.0.40
codegen_flags: <defaults>
</compile_context>

<pallas_src>
import functools

import jax
import jax.numpy as jnp
from jax.experimental import pallas as pl
from jax.experimental.pallas import tpu as pltpu

EPS = 1e-5          # torch nn.LayerNorm default eps
INV_SQRT2 = 0.7071067811865476

LAYER_PARAM_ORDER = ("ln1_g", "ln1_b", "wq", "wk", "wv", "wo", "bo",
                     "ln2_g", "ln2_b", "w1", "b1", "w2", "b2")


# ---------------------------------------------------------------- helpers ---
def _ln(x, g, b):
    """LayerNorm over the last axis in f32 (biased variance, matches torch)."""
    mu = jnp.mean(x, axis=-1, keepdims=True)
    var = jnp.mean((x - mu) ** 2, axis=-1, keepdims=True)
    return (x - mu) * jax.lax.rsqrt(var + EPS) * g + b


def _gelu_exact(x):
    """Exact (erf-based) GELU, matching torch nn.GELU() default."""
    return 0.5 * x * (1.0 + jax.lax.erf(x * INV_SQRT2))


def _wspec(shape):
    """Full-array block, replicated across all grid axes (constant weights)."""
    return pl.BlockSpec(shape, lambda *_: (0,) * len(shape))


# ---------------------------------------------------------------- kernels ---
def embed_kernel(patch_ref, ln1g, ln1b, w, b, ln2g, ln2b, clspos_ref, o_ref,
                 *, n_patches):
    """PatchEmbedder on a padded (S, patch_dim) block.

    Row 0 (cls slot) and rows > n_patches (sequence padding) are zero in the
    input; their embedding results are masked off and replaced by the
    precombined cls+pos tensor / zeros, so a single aligned store writes the
    whole (S, dim) block (no sublane-offset partial stores).
    """
    p = patch_ref[0].astype(jnp.float32)                    # (S, patch_dim)
    h = _ln(p, ln1g[...], ln1b[...]).astype(jnp.bfloat16)
    e = jnp.dot(h, w[...], preferred_element_type=jnp.float32) + b[...]
    e = _ln(e, ln2g[...], ln2b[...])                        # (S, D) f32
    S = e.shape[0]
    row = jax.lax.broadcasted_iota(jnp.int32, (S, 1), 0)
    is_patch = jnp.logical_and(row >= 1, row <= n_patches)  # (S, 1)
    out = jnp.where(is_patch, e, 0.0) + clspos_ref[...]     # cls+pos / pos / 0
    o_ref[0] = out.astype(o_ref.dtype)


def encoder_kernel(x_ref,
                   ln1g, ln1b, wq, wk, wv, wo, bo,
                   ln2g, ln2b, w1, b1, w2, b2,
                   o_ref, *, n_heads, seq_valid):
    """One grid step = (batch row b, layer l).

    The activation lives in the output VMEM block, resident across the depth
    ("arbitrary") axis; layer weights are selected per-l by their BlockSpecs.
    """
    @pl.when(pl.program_id(1) == 0)
    def _():
        o_ref[...] = x_ref[...]            # load the embeddings once per batch row

    x = o_ref[0].astype(jnp.float32)       # (S, D) resident activation, f32 math
    S = x.shape[0]

    # ---- PreNorm + multi-head attention (scale pre-folded into wq) ----
    h = _ln(x, ln1g[0], ln1b[0]).astype(jnp.bfloat16)
    wq_h, wk_h, wv_h, wo_h = wq[0], wk[0], wv[0], wo[0]   # (H,D,hd)/(H,hd,D) bf16
    q3 = jnp.stack([jnp.dot(h, wq_h[i], preferred_element_type=jnp.float32)
                    for i in range(n_heads)]).astype(jnp.bfloat16)   # (H, S, hd)
    k3 = jnp.stack([jnp.dot(h, wk_h[i], preferred_element_type=jnp.float32)
                    for i in range(n_heads)]).astype(jnp.bfloat16)
    v3 = jnp.stack([jnp.dot(h, wv_h[i], preferred_element_type=jnp.float32)
                    for i in range(n_heads)]).astype(jnp.bfloat16)

    scores = jnp.einsum("hqd,hkd->hqk", q3, k3,
                        preferred_element_type=jnp.float32)          # (H, S, S)
    key_pos = jax.lax.broadcasted_iota(jnp.int32, (1, S), 1)
    scores = jnp.where(key_pos >= seq_valid, -1e30, scores)          # mask pad keys
    scores = scores - jnp.max(scores, axis=-1, keepdims=True)
    p = jnp.exp(scores)
    p = p * pl.reciprocal(jnp.sum(p, axis=-1, keepdims=True), approx=True)

    ctx = jnp.einsum("hqk,hkd->hqd", p.astype(jnp.bfloat16), v3,
                     preferred_element_type=jnp.float32)             # (H, S, hd)
    attn = bo[0]                                                     # (1, D) f32
    for i in range(n_heads):                       # accumulate heads (no concat)
        attn = attn + jnp.dot(ctx[i].astype(jnp.bfloat16), wo_h[i],
                              preferred_element_type=jnp.float32)
    x = x + attn

    # ---- PreNorm + MLP ----
    h2 = _ln(x, ln2g[0], ln2b[0]).astype(jnp.bfloat16)
    m = jnp.dot(h2, w1[0], preferred_element_type=jnp.float32) + b1[0]
    m = _gelu_exact(m)                             # exact erf GELU (torch default)
    m = jnp.dot(m.astype(jnp.bfloat16), w2[0],
                preferred_element_type=jnp.float32) + b2[0]
    o_ref[0] = (x + m).astype(o_ref.dtype)


def head_kernel(x_ref, lng, lnb, w, b, o_ref):
    """mlp_head: LayerNorm(dim) -> Linear(dim, num_classes) on pooled tokens."""
    h = _ln(x_ref[...].astype(jnp.float32), lng[...], lnb[...]).astype(jnp.bfloat16)
    o_ref[...] = jnp.dot(h, w[...], preferred_element_type=jnp.float32) + b[...]


# --------------------------------------------------------------- wrappers ---
def patch_embed(patches, p, *, n_patches):
    B, S, PD = patches.shape
    D = p["w"].shape[1]
    kern = functools.partial(embed_kernel, n_patches=n_patches)
    return pl.pallas_call(
        kern,
        out_shape=jax.ShapeDtypeStruct((B, S, D), jnp.bfloat16),
        grid=(B,),
        in_specs=[
            pl.BlockSpec((1, S, PD), lambda b: (b, 0, 0)),
            _wspec(p["ln1_g"].shape), _wspec(p["ln1_b"].shape),
            _wspec(p["w"].shape), _wspec(p["b"].shape),
            _wspec(p["ln2_g"].shape), _wspec(p["ln2_b"].shape),
            _wspec(p["clspos"].shape),
        ],
        out_specs=pl.BlockSpec((1, S, D), lambda b: (b, 0, 0)),
        compiler_params=pltpu.CompilerParams(dimension_semantics=("parallel",)),
    )(patches, p["ln1_g"], p["ln1_b"], p["w"], p["b"],
      p["ln2_g"], p["ln2_b"], p["clspos"])


def transformer_encoder(x, lp, *, n_heads, seq_valid):
    """All encoder layers fused into one pallas_call over grid=(B, depth)."""
    B, S, D = x.shape
    depth = lp["wq"].shape[0]

    def layer_spec(shape):
        nd = len(shape)
        return pl.BlockSpec((1,) + tuple(shape[1:]),
                            lambda b, l, _nd=nd: (l,) + (0,) * (_nd - 1))

    kern = functools.partial(encoder_kernel, n_heads=n_heads, seq_valid=seq_valid)
    return pl.pallas_call(
        kern,
        out_shape=jax.ShapeDtypeStruct((B, S, D), jnp.bfloat16),
        grid=(B, depth),
        in_specs=[pl.BlockSpec((1, S, D), lambda b, l: (b, 0, 0))]
                 + [layer_spec(lp[k].shape) for k in LAYER_PARAM_ORDER],
        out_specs=pl.BlockSpec((1, S, D), lambda b, l: (b, 0, 0)),
        compiler_params=pltpu.CompilerParams(
            dimension_semantics=("parallel", "arbitrary"),
            # Explicit scoped-VMEM budget; stays under v7x's 64 MiB physical.
            vmem_limit_bytes=48 * 1024 * 1024),
    )(x, *[lp[k] for k in LAYER_PARAM_ORDER])


def mlp_head(pooled, p):
    B, D = pooled.shape
    C = p["w"].shape[1]
    return pl.pallas_call(
        head_kernel,
        out_shape=jax.ShapeDtypeStruct((B, C), jnp.float32),
        grid=(1,),
        in_specs=[
            pl.BlockSpec((B, D), lambda i: (0, 0)),
            _wspec(p["ln_g"].shape), _wspec(p["ln_b"].shape),
            _wspec(p["w"].shape), _wspec(p["b"].shape),
        ],
        out_specs=pl.BlockSpec((B, C), lambda i: (0, 0)),
    )(pooled, p["ln_g"], p["ln_b"], p["w"], p["b"])


def extract_patches(x, ph, pw):
    """'b c (h p1) (w p2) -> b (h w) (p1 p2 c)' — pure JAX glue."""
    B, C, H, W = x.shape
    gh, gw = H // ph, W // pw
    x = x.reshape(B, C, gh, ph, gw, pw)
    x = x.transpose(0, 2, 4, 3, 5, 1)          # b, h, w, p1, p2, c
    return x.reshape(B, gh * gw, ph * pw * C)


def vit_forward(x_nchw, params, *, patch_size, n_heads, seq_pad):
    # TODO(synk): dropout (p=0.0 in config -> identity) and ViTPoolType.mean
    # pooling are not implemented; default cls_token pooling is used.
    ph, pw = patch_size
    patches = extract_patches(x_nchw, ph, pw)              # (B, N, patch_dim)
    B, N, PD = patches.shape
    # Row 0 reserved for the cls token; trailing rows pad the sequence to a
    # sublane-aligned length (filled in-kernel / masked in attention).
    patches = jnp.pad(patches, ((0, 0), (1, seq_pad - N - 1), (0, 0)))
    x = patch_embed(patches, params["embed"], n_patches=N)  # (B, S_pad, D) bf16
    x = transformer_encoder(x, params["layers"], n_heads=n_heads,
                            seq_valid=N + 1)                 # fused depth loop
    pooled = x[:, 0]                                         # cls_token pooling
    return mlp_head(pooled, params["head"])                  # (B, num_classes) f32


# ------------------------------------------------------------------- init ---
def init_params(key, *, num_channels, patch_size, num_patches, dim, mlp_hidden,
                depth, n_heads, num_classes, seq_pad):
    ph, pw = patch_size
    patch_dim = ph * pw * num_channels
    hd = dim // n_heads
    scale = hd ** -0.5
    f32, bf16 = jnp.float32, jnp.bfloat16
    keys = iter(jax.random.split(key, 64))

    def nrm(shape, s=0.02, dtype=bf16):
        return (s * jax.random.normal(next(keys), shape)).astype(dtype)

    # ---- patch embedder ----
    cls = jax.random.normal(next(keys), (1, dim)).astype(f32)
    pos = jax.random.normal(next(keys), (num_patches + 1, dim)).astype(f32)
    # Precombined (seq_pad, dim) additive tensor:
    #   row 0                 -> cls + pos[0]
    #   rows 1..num_patches   -> pos[1:]     (patch embedding added in-kernel)
    #   rows beyond           -> 0           (sequence padding rows stay zero)
    clspos = jnp.zeros((seq_pad, dim), f32)
    clspos = clspos.at[:num_patches + 1].set(pos)
    clspos = clspos.at[0].add(cls[0])
    embed = dict(
        ln1_g=jnp.ones((1, patch_dim), f32), ln1_b=jnp.zeros((1, patch_dim), f32),
        w=nrm((patch_dim, dim)), b=jnp.zeros((1, dim), f32),
        ln2_g=jnp.ones((1, dim), f32), ln2_b=jnp.zeros((1, dim), f32),
        clspos=clspos,
    )

    # ---- transformer layers, stacked along a leading depth axis ----
    layers = dict(
        ln1_g=jnp.ones((depth, 1, dim), f32), ln1_b=jnp.zeros((depth, 1, dim), f32),
        # Per-head projection weights; attention scale folded into wq.
        wq=(nrm((depth, n_heads, dim, hd), dtype=f32) * scale).astype(bf16),
        wk=nrm((depth, n_heads, dim, hd)),
        wv=nrm((depth, n_heads, dim, hd)),
        wo=nrm((depth, n_heads, hd, dim)),
        bo=jnp.zeros((depth, 1, dim), f32),
        ln2_g=jnp.ones((depth, 1, dim), f32), ln2_b=jnp.zeros((depth, 1, dim), f32),
        w1=nrm((depth, dim, mlp_hidden)), b1=jnp.zeros((depth, 1, mlp_hidden), f32),
        w2=nrm((depth, mlp_hidden, dim)), b2=jnp.zeros((depth, 1, dim), f32),
    )

    head = dict(
        ln_g=jnp.ones((1, dim), f32), ln_b=jnp.zeros((1, dim), f32),
        w=nrm((dim, num_classes)), b=jnp.zeros((1, num_classes), f32),
    )
    return dict(embed=embed, layers=layers, head=head)


# ------------------------------------------------------------------- main ---
if __name__ == "__main__":
    # Small ViT config: image 16x16, 4 channels, patch 4x4 -> 16 patches (+cls),
    # dim=32, 4 heads, mlp hidden=64, depth=2, 8 classes, cls_token pooling.
    B, C, H, W = 2, 4, 16, 16
    patch_size = (4, 4)
    num_patches = (H // patch_size[0]) * (W // patch_size[1])   # 16
    dim, n_heads, mlp_hidden, depth, num_classes = 32, 4, 64, 2, 8
    seq = num_patches + 1                                        # 17
    seq_pad = ((seq + 7) // 8) * 8                               # 24 (sublane aligned)

    key = jax.random.PRNGKey(0)
    k_params, k_x = jax.random.split(key)
    params = init_params(
        k_params, num_channels=C, patch_size=patch_size,
        num_patches=num_patches, dim=dim, mlp_hidden=mlp_hidden,
        depth=depth, n_heads=n_heads, num_classes=num_classes, seq_pad=seq_pad)

    x = jax.random.normal(k_x, (B, C, H, W), dtype=jnp.float32)

    fwd = jax.jit(functools.partial(
        vit_forward, patch_size=patch_size, n_heads=n_heads, seq_pad=seq_pad))
    logits = fwd(x, params)
    jax.block_until_ready(logits)
    assert logits.shape == (B, num_classes), logits.shape
    assert logits.dtype == jnp.float32
    print("KERNEL_OK")
</pallas_src>

<mosaic_0001>
module attributes {stable_mosaic.version = 11 : i64} {
  func.func @embed_kernel(%arg0: i32, %arg1: memref<1x24x64xf32, #tpu.memory_space<vmem>>, %arg2: memref<1x64xf32, #tpu.memory_space<vmem>>, %arg3: memref<1x64xf32, #tpu.memory_space<vmem>>, %arg4: memref<64x32xbf16, #tpu.memory_space<vmem>>, %arg5: memref<1x32xf32, #tpu.memory_space<vmem>>, %arg6: memref<1x32xf32, #tpu.memory_space<vmem>>, %arg7: memref<1x32xf32, #tpu.memory_space<vmem>>, %arg8: memref<24x32xf32, #tpu.memory_space<vmem>>, %arg9: memref<1x24x32xbf16, #tpu.memory_space<vmem>>) attributes {dimension_semantics = [#tpu.dimension_semantics<parallel>], iteration_bounds = array<i64: 2>, scalar_prefetch = 0 : i64, scratch_operands = 0 : i64, tpu.core_type = #tpu.core_type<tc>, window_params = [{transform_indices = @transform_0, window_bounds = array<i64: 1, 24, 64>}, {pipeline_mode = #tpu.pipeline_mode<synchronous>, transform_indices = @transform_1, window_bounds = array<i64: 1, 64>}, {pipeline_mode = #tpu.pipeline_mode<synchronous>, transform_indices = @transform_2, window_bounds = array<i64: 1, 64>}, {pipeline_mode = #tpu.pipeline_mode<synchronous>, transform_indices = @transform_3, window_bounds = array<i64: 64, 32>}, {pipeline_mode = #tpu.pipeline_mode<synchronous>, transform_indices = @transform_4, window_bounds = array<i64: 1, 32>}, {pipeline_mode = #tpu.pipeline_mode<synchronous>, transform_indices = @transform_5, window_bounds = array<i64: 1, 32>}, {pipeline_mode = #tpu.pipeline_mode<synchronous>, transform_indices = @transform_6, window_bounds = array<i64: 1, 32>}, {pipeline_mode = #tpu.pipeline_mode<synchronous>, transform_indices = @transform_7, window_bounds = array<i64: 24, 32>}, {transform_indices = @transform_8, window_bounds = array<i64: 1, 24, 32>}]} {
    %c0 = arith.constant 0 : index
    %c0_0 = arith.constant 0 : index
    %c0_1 = arith.constant 0 : index
    %0 = vector.load %arg1[%c0, %c0_0, %c0_1] : memref<1x24x64xf32, #tpu.memory_space<vmem>>, vector<1x24x64xf32>
    %1 = vector.shape_cast %0 : vector<1x24x64xf32> to vector<24x64xf32>
    %c0_2 = arith.constant 0 : index
    %c0_3 = arith.constant 0 : index
    %2 = vector.load %arg2[%c0_2, %c0_3] : memref<1x64xf32, #tpu.memory_space<vmem>>, vector<1x64xf32>
    %c0_4 = arith.constant 0 : index
    %c0_5 = arith.constant 0 : index
    %3 = vector.load %arg3[%c0_4, %c0_5] : memref<1x64xf32, #tpu.memory_space<vmem>>, vector<1x64xf32>
    %cst = arith.constant dense<0.000000e+00> : vector<24xf32>
    %4 = vector.multi_reduction <add>, %1, %cst [1] : vector<24x64xf32> to vector<24xf32>
    %5 = vector.shape_cast %4 : vector<24xf32> to vector<24x1xf32>
    %cst_6 = arith.constant 6.400000e+01 : f32
    %6 = vector.broadcast %cst_6 : f32 to vector<24x1xf32>
    %7 = arith.divf %5, %6 : vector<24x1xf32>
    %8 = vector.broadcast %7 : vector<24x1xf32> to vector<24x64xf32>
    %9 = arith.subf %1, %8 : vector<24x64xf32>
    %10 = arith.mulf %9, %9 : vector<24x64xf32>
    %cst_7 = arith.constant dense<0.000000e+00> : vector<24xf32>
    %11 = vector.multi_reduction <add>, %10, %cst_7 [1] : vector<24x64xf32> to vector<24xf32>
    %12 = vector.shape_cast %11 : vector<24xf32> to vector<24x1xf32>
    %cst_8 = arith.constant 6.400000e+01 : f32
    %13 = vector.broadcast %cst_8 : f32 to vector<24x1xf32>
    %14 = arith.divf %12, %13 : vector<24x1xf32>
    %15 = vector.broadcast %7 : vector<24x1xf32> to vector<24x64xf32>
    %16 = arith.subf %1, %15 : vector<24x64xf32>
    %cst_9 = arith.constant 9.99999974E-6 : f32
    %17 = vector.broadcast %cst_9 : f32 to vector<24x1xf32>
    %18 = arith.addf %14, %17 : vector<24x1xf32>
    %19 = math.rsqrt %18 : vector<24x1xf32>
    %20 = vector.broadcast %19 : vector<24x1xf32> to vector<24x64xf32>
    %21 = arith.mulf %16, %20 : vector<24x64xf32>
    %22 = vector.broadcast %2 : vector<1x64xf32> to vector<24x64xf32>
    %23 = arith.mulf %21, %22 : vector<24x64xf32>
    %24 = vector.broadcast %3 : vector<1x64xf32> to vector<24x64xf32>
    %25 = arith.addf %23, %24 : vector<24x64xf32>
    %26 = arith.truncf %25 : vector<24x64xf32> to vector<24x64xbf16>
    %c0_10 = arith.constant 0 : index
    %c0_11 = arith.constant 0 : index
    %27 = vector.load %arg4[%c0_10, %c0_11] : memref<64x32xbf16, #tpu.memory_space<vmem>>, vector<64x32xbf16>
    %cst_12 = arith.constant dense<0.000000e+00> : vector<24x32xf32>
    %28 = tpu.matmul %26, %27, %cst_12 {dimension_numbers = #tpu.dot_dimension_numbers<[1], [0], [0], [1], [0, 0, 1, 1], [], []>} : vector<24x64xbf16>, vector<64x32xbf16>, vector<24x32xf32> -> vector<24x32xf32>
    %c0_13 = arith.constant 0 : index
    %c0_14 = arith.constant 0 : index
    %29 = vector.load %arg5[%c0_13, %c0_14] : memref<1x32xf32, #tpu.memory_space<vmem>>, vector<1x32xf32>
    %30 = vector.broadcast %29 : vector<1x32xf32> to vector<24x32xf32>
    %31 = arith.addf %28, %30 : vector<24x32xf32>
    %c0_15 = arith.constant 0 : index
    %c0_16 = arith.constant 0 : index
    %32 = vector.load %arg6[%c0_15, %c0_16] : memref<1x32xf32, #tpu.memory_space<vmem>>, vector<1x32xf32>
    %c0_17 = arith.constant 0 : index
    %c0_18 = arith.constant 0 : index
    %33 = vector.load %arg7[%c0_17, %c0_18] : memref<1x32xf32, #tpu.memory_space<vmem>>, vector<1x32xf32>
    %cst_19 = arith.constant dense<0.000000e+00> : vector<24xf32>
    %34 = vector.multi_reduction <add>, %31, %cst_19 [1] : vector<24x32xf32> to vector<24xf32>
    %35 = vector.shape_cast %34 : vector<24xf32> to vector<24x1xf32>
    %cst_20 = arith.constant 3.200000e+01 : f32
    %36 = vector.broadcast %cst_20 : f32 to vector<24x1xf32>
    %37 = arith.divf %35, %36 : vector<24x1xf32>
    %38 = vector.broadcast %37 : vector<24x1xf32> to vector<24x32xf32>
    %39 = arith.subf %31, %38 : vector<24x32xf32>
    %40 = arith.mulf %39, %39 : vector<24x32xf32>
    %cst_21 = arith.constant dense<0.000000e+00> : vector<24xf32>
    %41 = vector.multi_reduction <add>, %40, %cst_21 [1] : vector<24x32xf32> to vector<24xf32>
    %42 = vector.shape_cast %41 : vector<24xf32> to vector<24x1xf32>
    %cst_22 = arith.constant 3.200000e+01 : f32
    %43 = vector.broadcast %cst_22 : f32 to vector<24x1xf32>
    %44 = arith.divf %42, %43 : vector<24x1xf32>
    %45 = vector.broadcast %37 : vector<24x1xf32> to vector<24x32xf32>
    %46 = arith.subf %31, %45 : vector<24x32xf32>
    %cst_23 = arith.constant 9.99999974E-6 : f32
    %47 = vector.broadcast %cst_23 : f32 to vector<24x1xf32>
    %48 = arith.addf %44, %47 : vector<24x1xf32>
    %49 = math.rsqrt %48 : vector<24x1xf32>
    %50 = vector.broadcast %49 : vector<24x1xf32> to vector<24x32xf32>
    %51 = arith.mulf %46, %50 : vector<24x32xf32>
    %52 = vector.broadcast %32 : vector<1x32xf32> to vector<24x32xf32>
    %53 = arith.mulf %51, %52 : vector<24x32xf32>
    %54 = vector.broadcast %33 : vector<1x32xf32> to vector<24x32xf32>
    %55 = arith.addf %53, %54 : vector<24x32xf32>
    %56 = tpu.iota {dimensions = array<i32: 0>} : vector<24x1xi32>
    %c1_i32 = arith.constant 1 : i32
    %57 = vector.broadcast %c1_i32 : i32 to vector<24x1xi32>
    %58 = arith.cmpi sge, %56, %57 : vector<24x1xi32>
    %c16_i32 = arith.constant 16 : i32
    %59 = vector.broadcast %c16_i32 : i32 to vector<24x1xi32>
    %60 = arith.cmpi sle, %56, %59 : vector<24x1xi32>
    %61 = arith.andi %58, %60 : vector<24x1xi1>
    %cst_24 = arith.constant 0.000000e+00 : f32
    %62 = vector.shape_cast %61 : vector<24x1xi1> to vector<24x1xi1>
    %63 = vector.broadcast %62 : vector<24x1xi1> to vector<24x32xi1>
    %64 = vector.broadcast %cst_24 : f32 to vector<24x32xf32>
    %65 = arith.select %63, %55, %64 : vector<24x32xi1>, vector<24x32xf32>
    %c0_25 = arith.constant 0 : index
    %c0_26 = arith.constant 0 : index
    %66 = vector.load %arg8[%c0_25, %c0_26] : memref<24x32xf32, #tpu.memory_space<vmem>>, vector<24x32xf32>
    %67 = arith.addf %65, %66 : vector<24x32xf32>
    %68 = arith.truncf %67 : vector<24x32xf32> to vector<24x32xbf16>
    %c0_27 = arith.constant 0 : index
    %c0_28 = arith.constant 0 : index
    %c0_29 = arith.constant 0 : index
    %69 = vector.load %arg9[%c0_27, %c0_28, %c0_29] : memref<1x24x32xbf16, #tpu.memory_space<vmem>>, vector<1x24x32xbf16>
    %70 = vector.shape_cast %69 : vector<1x24x32xbf16> to vector<24x32xbf16>
    %71 = vector.shape_cast %68 : vector<24x32xbf16> to vector<1x24x32xbf16>
    tpu.vector_store %arg9[%c0_27, %c0_28, %c0_29], %71 {strides = array<i32>} : memref<1x24x32xbf16, #tpu.memory_space<vmem>>, vector<1x24x32xbf16>,
    return
  }
  func.func @transform_0(%arg0: i32) -> (i32, i32, i32) {
    %c0_i32 = arith.constant 0 : i32
    %c0_i32_0 = arith.constant 0 : i32
    %c0_i32_1 = arith.constant 0 : i32
    return %arg0, %c0_i32, %c0_i32_0 : i32, i32, i32
  }
  func.func @transform_1(%arg0: i32) -> (i32, i32) {
    %c0_i32 = arith.constant 0 : i32
    %c0_i32_0 = arith.constant 0 : i32
    %c0_i32_1 = arith.constant 0 : i32
    return %c0_i32, %c0_i32_0 : i32, i32
  }
  func.func @transform_2(%arg0: i32) -> (i32, i32) {
    %c0_i32 = arith.constant 0 : i32
    %c0_i32_0 = arith.constant 0 : i32
    %c0_i32_1 = arith.constant 0 : i32
    return %c0_i32, %c0_i32_0 : i32, i32
  }
  func.func @transform_3(%arg0: i32) -> (i32, i32) {
    %c0_i32 = arith.constant 0 : i32
    %c0_i32_0 = arith.constant 0 : i32
    %c0_i32_1 = arith.constant 0 : i32
    return %c0_i32, %c0_i32_0 : i32, i32
  }
  func.func @transform_4(%arg0: i32) -> (i32, i32) {
    %c0_i32 = arith.constant 0 : i32
    %c0_i32_0 = arith.constant 0 : i32
    %c0_i32_1 = arith.constant 0 : i32
    return %c0_i32, %c0_i32_0 : i32, i32
  }
  func.func @transform_5(%arg0: i32) -> (i32, i32) {
    %c0_i32 = arith.constant 0 : i32
    %c0_i32_0 = arith.constant 0 : i32
    %c0_i32_1 = arith.constant 0 : i32
    return %c0_i32, %c0_i32_0 : i32, i32
  }
  func.func @transform_6(%arg0: i32) -> (i32, i32) {
    %c0_i32 = arith.constant 0 : i32
    %c0_i32_0 = arith.constant 0 : i32
    %c0_i32_1 = arith.constant 0 : i32
    return %c0_i32, %c0_i32_0 : i32, i32
  }
  func.func @transform_7(%arg0: i32) -> (i32, i32) {
    %c0_i32 = arith.constant 0 : i32
    %c0_i32_0 = arith.constant 0 : i32
    %c0_i32_1 = arith.constant 0 : i32
    return %c0_i32, %c0_i32_0 : i32, i32
  }
  func.func @transform_8(%arg0: i32) -> (i32, i32, i32) {
    %c0_i32 = arith.constant 0 : i32
    %c0_i32_0 = arith.constant 0 : i32
    %c0_i32_1 = arith.constant 0 : i32
    return %arg0, %c0_i32, %c0_i32_0 : i32, i32, i32
  }
}

module attributes {stable_mosaic.version = 11 : i64} {
  func.func @encoder_kernel(%arg0: i32, %arg1: i32, %arg2: memref<1x24x32xbf16, #tpu.memory_space<vmem>>, %arg3: memref<1x1x32xf32, #tpu.memory_space<vmem>>, %arg4: memref<1x1x32xf32, #tpu.memory_space<vmem>>, %arg5: memref<1x4x32x8xbf16, #tpu.memory_space<vmem>>, %arg6: memref<1x4x32x8xbf16, #tpu.memory_space<vmem>>, %arg7: memref<1x4x32x8xbf16, #tpu.memory_space<vmem>>, %arg8: memref<1x4x8x32xbf16, #tpu.memory_space<vmem>>, %arg9: memref<1x1x32xf32, #tpu.memory_space<vmem>>, %arg10: memref<1x1x32xf32, #tpu.memory_space<vmem>>, %arg11: memref<1x1x32xf32, #tpu.memory_space<vmem>>, %arg12: memref<1x32x64xbf16, #tpu.memory_space<vmem>>, %arg13: memref<1x1x64xf32, #tpu.memory_space<vmem>>, %arg14: memref<1x64x32xbf16, #tpu.memory_space<vmem>>, %arg15: memref<1x1x32xf32, #tpu.memory_space<vmem>>, %arg16: memref<1x24x32xbf16, #tpu.memory_space<vmem>>) attributes {dimension_semantics = [#tpu.dimension_semantics<parallel>, #tpu.dimension_semantics<arbitrary>], iteration_bounds = array<i64: 2, 2>, scalar_prefetch = 0 : i64, scratch_operands = 0 : i64, tpu.core_type = #tpu.core_type<tc>, window_params = [{transform_indices = @transform_0, window_bounds = array<i64: 1, 24, 32>}, {transform_indices = @transform_1, window_bounds = array<i64: 1, 1, 32>}, {transform_indices = @transform_2, window_bounds = array<i64: 1, 1, 32>}, {transform_indices = @transform_3, window_bounds = array<i64: 1, 4, 32, 8>}, {transform_indices = @transform_4, window_bounds = array<i64: 1, 4, 32, 8>}, {transform_indices = @transform_5, window_bounds = array<i64: 1, 4, 32, 8>}, {transform_indices = @transform_6, window_bounds = array<i64: 1, 4, 8, 32>}, {transform_indices = @transform_7, window_bounds = array<i64: 1, 1, 32>}, {transform_indices = @transform_8, window_bounds = array<i64: 1, 1, 32>}, {transform_indices = @transform_9, window_bounds = array<i64: 1, 1, 32>}, {transform_indices = @transform_10, window_bounds = array<i64: 1, 32, 64>}, {transform_indices = @transform_11, window_bounds = array<i64: 1, 1, 64>}, {transform_indices = @transform_12, window_bounds = array<i64: 1, 64, 32>}, {transform_indices = @transform_13, window_bounds = array<i64: 1, 1, 32>}, {transform_indices = @transform_14, window_bounds = array<i64: 1, 24, 32>}]} {
    %c0_i32 = arith.constant 0 : i32
    %0 = arith.cmpi eq, %arg1, %c0_i32 : i32
    %1 = arith.extui %0 : i1 to i32
    %c0_i32_0 = arith.constant 0 : i32
    %2 = arith.cmpi ne, %1, %c0_i32_0 : i32
    scf.if %2 {
      %c0_84 = arith.constant 0 : index
      %c0_85 = arith.constant 0 : index
      %c0_86 = arith.constant 0 : index
      %202 = vector.load %arg2[%c0_84, %c0_85, %c0_86] : memref<1x24x32xbf16, #tpu.memory_space<vmem>>, vector<1x24x32xbf16>
      %c0_87 = arith.constant 0 : index
      %c0_88 = arith.constant 0 : index
      %c0_89 = arith.constant 0 : index
      %203 = vector.load %arg16[%c0_87, %c0_88, %c0_89] : memref<1x24x32xbf16, #tpu.memory_space<vmem>>, vector<1x24x32xbf16>
      tpu.vector_store %arg16[%c0_87, %c0_88, %c0_89], %202 {strides = array<i32>} : memref<1x24x32xbf16, #tpu.memory_space<vmem>>, vector<1x24x32xbf16>,
    } else {
    }
    %c0 = arith.constant 0 : index
    %c0_1 = arith.constant 0 : index
    %c0_2 = arith.constant 0 : index
    %3 = vector.load %arg16[%c0, %c0_1, %c0_2] : memref<1x24x32xbf16, #tpu.memory_space<vmem>>, vector<1x24x32xbf16>
    %4 = vector.shape_cast %3 : vector<1x24x32xbf16> to vector<24x32xbf16>
    %5 = arith.extf %4 : vector<24x32xbf16> to vector<24x32xf32>
    %c0_3 = arith.constant 0 : index
    %c0_4 = arith.constant 0 : index
    %c0_5 = arith.constant 0 : index
    %6 = vector.load %arg3[%c0_3, %c0_4, %c0_5] : memref<1x1x32xf32, #tpu.memory_space<vmem>>, vector<1x1x32xf32>
    %7 = vector.shape_cast %6 : vector<1x1x32xf32> to vector<1x32xf32>
    %c0_6 = arith.constant 0 : index
    %c0_7 = arith.constant 0 : index
    %c0_8 = arith.constant 0 : index
    %8 = vector.load %arg4[%c0_6, %c0_7, %c0_8] : memref<1x1x32xf32, #tpu.memory_space<vmem>>, vector<1x1x32xf32>
    %9 = vector.shape_cast %8 : vector<1x1x32xf32> to vector<1x32xf32>
    %cst = arith.constant dense<0.000000e+00> : vector<24xf32>
    %10 = vector.multi_reduction <add>, %5, %cst [1] : vector<24x32xf32> to vector<24xf32>
    %11 = vector.shape_cast %10 : vector<24xf32> to vector<24x1xf32>
    %cst_9 = arith.constant 3.200000e+01 : f32
    %12 = vector.broadcast %cst_9 : f32 to vector<24x1xf32>
    %13 = arith.divf %11, %12 : vector<24x1xf32>
    %14 = vector.broadcast %13 : vector<24x1xf32> to vector<24x32xf32>
    %15 = arith.subf %5, %14 : vector<24x32xf32>
    %16 = arith.mulf %15, %15 : vector<24x32xf32>
    %cst_10 = arith.constant dense<0.000000e+00> : vector<24xf32>
    %17 = vector.multi_reduction <add>, %16, %cst_10 [1] : vector<24x32xf32> to vector<24xf32>
    %18 = vector.shape_cast %17 : vector<24xf32> to vector<24x1xf32>
    %cst_11 = arith.constant 3.200000e+01 : f32
    %19 = vector.broadcast %cst_11 : f32 to vector<24x1xf32>
    %20 = arith.divf %18, %19 : vector<24x1xf32>
    %21 = vector.broadcast %13 : vector<24x1xf32> to vector<24x32xf32>
    %22 = arith.subf %5, %21 : vector<24x32xf32>
    %cst_12 = arith.constant 9.99999974E-6 : f32
    %23 = vector.broadcast %cst_12 : f32 to vector<24x1xf32>
    %24 = arith.addf %20, %23 : vector<24x1xf32>
    %25 = math.rsqrt %24 : vector<24x1xf32>
    %26 = vector.broadcast %25 : vector<24x1xf32> to vector<24x32xf32>
    %27 = arith.mulf %22, %26 : vector<24x32xf32>
    %28 = vector.broadcast %7 : vector<1x32xf32> to vector<24x32xf32>
    %29 = arith.mulf %27, %28 : vector<24x32xf32>
    %30 = vector.broadcast %9 : vector<1x32xf32> to vector<24x32xf32>
    %31 = arith.addf %29, %30 : vector<24x32xf32>
    %32 = arith.truncf %31 : vector<24x32xf32> to vector<24x32xbf16>
    %c0_13 = arith.constant 0 : index
    %c0_14 = arith.constant 0 : index
    %c0_15 = arith.constant 0 : index
    %c0_16 = arith.constant 0 : index
    %33 = vector.load %arg5[%c0_13, %c0_14, %c0_15, %c0_16] : memref<1x4x32x8xbf16, #tpu.memory_space<vmem>>, vector<1x4x32x8xbf16>
    %34 = vector.shape_cast %33 : vector<1x4x32x8xbf16> to vector<4x32x8xbf16>
    %c0_17 = arith.constant 0 : index
    %c0_18 = arith.constant 0 : index
    %c0_19 = arith.constant 0 : index
    %c0_20 = arith.constant 0 : index
    %35 = vector.load %arg6[%c0_17, %c0_18, %c0_19, %c0_20] : memref<1x4x32x8xbf16, #tpu.memory_space<vmem>>, vector<1x4x32x8xbf16>
    %36 = vector.shape_cast %35 : vector<1x4x32x8xbf16> to vector<4x32x8xbf16>
    %c0_21 = arith.constant 0 : index
    %c0_22 = arith.constant 0 : index
    %c0_23 = arith.constant 0 : index
    %c0_24 = arith.constant 0 : index
    %37 = vector.load %arg7[%c0_21, %c0_22, %c0_23, %c0_24] : memref<1x4x32x8xbf16, #tpu.memory_space<vmem>>, vector<1x4x32x8xbf16>
    %38 = vector.shape_cast %37 : vector<1x4x32x8xbf16> to vector<4x32x8xbf16>
    %c0_25 = arith.constant 0 : index
    %c0_26 = arith.constant 0 : index
    %c0_27 = arith.constant 0 : index
    %c0_28 = arith.constant 0 : index
    %39 = vector.load %arg8[%c0_25, %c0_26, %c0_27, %c0_28] : memref<1x4x8x32xbf16, #tpu.memory_space<vmem>>, vector<1x4x8x32xbf16>
    %40 = vector.shape_cast %39 : vector<1x4x8x32xbf16> to vector<4x8x32xbf16>
    %41 = vector.extract_strided_slice %34 {offsets = [0, 0, 0], sizes = [1, 32, 8], strides = [1, 1, 1]} : vector<4x32x8xbf16> to vector<1x32x8xbf16>
    %42 = vector.shape_cast %41 : vector<1x32x8xbf16> to vector<32x8xbf16>
    %cst_29 = arith.constant dense<0.000000e+00> : vector<24x8xf32>
    %43 = tpu.matmul %32, %42, %cst_29 {dimension_numbers = #tpu.dot_dimension_numbers<[1], [0], [0], [1], [0, 0, 1, 1], [], []>} : vector<24x32xbf16>, vector<32x8xbf16>, vector<24x8xf32> -> vector<24x8xf32>
    %44 = vector.extract_strided_slice %34 {offsets = [1, 0, 0], sizes = [1, 32, 8], strides = [1, 1, 1]} : vector<4x32x8xbf16> to vector<1x32x8xbf16>
    %45 = vector.shape_cast %44 : vector<1x32x8xbf16> to vector<32x8xbf16>
    %cst_30 = arith.constant dense<0.000000e+00> : vector<24x8xf32>
    %46 = tpu.matmul %32, %45, %cst_30 {dimension_numbers = #tpu.dot_dimension_numbers<[1], [0], [0], [1], [0, 0, 1, 1], [], []>} : vector<24x32xbf16>, vector<32x8xbf16>, vector<24x8xf32> -> vector<24x8xf32>
    %47 = vector.extract_strided_slice %34 {offsets = [2, 0, 0], sizes = [1, 32, 8], strides = [1, 1, 1]} : vector<4x32x8xbf16> to vector<1x32x8xbf16>
    %48 = vector.shape_cast %47 : vector<1x32x8xbf16> to vector<32x8xbf16>
    %cst_31 = arith.constant dense<0.000000e+00> : vector<24x8xf32>
    %49 = tpu.matmul %32, %48, %cst_31 {dimension_numbers = #tpu.dot_dimension_numbers<[1], [0], [0], [1], [0, 0, 1, 1], [], []>} : vector<24x32xbf16>, vector<32x8xbf16>, vector<24x8xf32> -> vector<24x8xf32>
    %50 = vector.extract_strided_slice %34 {offsets = [3, 0, 0], sizes = [1, 32, 8], strides = [1, 1, 1]} : vector<4x32x8xbf16> to vector<1x32x8xbf16>
    %51 = vector.shape_cast %50 : vector<1x32x8xbf16> to vector<32x8xbf16>
    %cst_32 = arith.constant dense<0.000000e+00> : vector<24x8xf32>
    %52 = tpu.matmul %32, %51, %cst_32 {dimension_numbers = #tpu.dot_dimension_numbers<[1], [0], [0], [1], [0, 0, 1, 1], [], []>} : vector<24x32xbf16>, vector<32x8xbf16>, vector<24x8xf32> -> vector<24x8xf32>
    %53 = vector.shape_cast %43 : vector<24x8xf32> to vector<1x24x8xf32>
    %54 = vector.shape_cast %46 : vector<24x8xf32> to vector<1x24x8xf32>
    %55 = vector.shape_cast %49 : vector<24x8xf32> to vector<1x24x8xf32>
    %56 = vector.shape_cast %52 : vector<24x8xf32> to vector<1x24x8xf32>
    %57 = tpu.concatenate %53, %54, %55, %56 in 0 : vector<1x24x8xf32>, vector<1x24x8xf32>, vector<1x24x8xf32>, vector<1x24x8xf32> -> vector<4x24x8xf32>
    %58 = arith.truncf %57 : vector<4x24x8xf32> to vector<4x24x8xbf16>
    %59 = vector.extract_strided_slice %36 {offsets = [0, 0, 0], sizes = [1, 32, 8], strides = [1, 1, 1]} : vector<4x32x8xbf16> to vector<1x32x8xbf16>
    %60 = vector.shape_cast %59 : vector<1x32x8xbf16> to vector<32x8xbf16>
    %cst_33 = arith.constant dense<0.000000e+00> : vector<24x8xf32>
    %61 = tpu.matmul %32, %60, %cst_33 {dimension_numbers = #tpu.dot_dimension_numbers<[1], [0], [0], [1], [0, 0, 1, 1], [], []>} : vector<24x32xbf16>, vector<32x8xbf16>, vector<24x8xf32> -> vector<24x8xf32>
    %62 = vector.extract_strided_slice %36 {offsets = [1, 0, 0], sizes = [1, 32, 8], strides = [1, 1, 1]} : vector<4x32x8xbf16> to vector<1x32x8xbf16>
    %63 = vector.shape_cast %62 : vector<1x32x8xbf16> to vector<32x8xbf16>
    %cst_34 = arith.constant dense<0.000000e+00> : vector<24x8xf32>
    %64 = tpu.matmul %32, %63, %cst_34 {dimension_numbers = #tpu.dot_dimension_numbers<[1], [0], [0], [1], [0, 0, 1, 1], [], []>} : vector<24x32xbf16>, vector<32x8xbf16>, vector<24x8xf32> -> vector<24x8xf32>
    %65 = vector.extract_strided_slice %36 {offsets = [2, 0, 0], sizes = [1, 32, 8], strides = [1, 1, 1]} : vector<4x32x8xbf16> to vector<1x32x8xbf16>
    %66 = vector.shape_cast %65 : vector<1x32x8xbf16> to vector<32x8xbf16>
    %cst_35 = arith.constant dense<0.000000e+00> : vector<24x8xf32>
    %67 = tpu.matmul %32, %66, %cst_35 {dimension_numbers = #tpu.dot_dimension_numbers<[1], [0], [0], [1], [0, 0, 1, 1], [], []>} : vector<24x32xbf16>, vector<32x8xbf16>, vector<24x8xf32> -> vector<24x8xf32>
    %68 = vector.extract_strided_slice %36 {offsets = [3, 0, 0], sizes = [1, 32, 8], strides = [1, 1, 1]} : vector<4x32x8xbf16> to vector<1x32x8xbf16>
    %69 = vector.shape_cast %68 : vector<1x32x8xbf16> to vector<32x8xbf16>
    %cst_36 = arith.constant dense<0.000000e+00> : vector<24x8xf32>
    %70 = tpu.matmul %32, %69, %cst_36 {dimension_numbers = #tpu.dot_dimension_numbers<[1], [0], [0], [1], [0, 0, 1, 1], [], []>} : vector<24x32xbf16>, vector<32x8xbf16>, vector<24x8xf32> -> vector<24x8xf32>
    %71 = vector.shape_cast %61 : vector<24x8xf32> to vector<1x24x8xf32>
    %72 = vector.shape_cast %64 : vector<24x8xf32> to vector<1x24x8xf32>
    %73 = vector.shape_cast %67 : vector<24x8xf32> to vector<1x24x8xf32>
    %74 = vector.shape_cast %70 : vector<24x8xf32> to vector<1x24x8xf32>
    %75 = tpu.concatenate %71, %72, %73, %74 in 0 : vector<1x24x8xf32>, vector<1x24x8xf32>, vector<1x24x8xf32>, vector<1x24x8xf32> -> vector<4x24x8xf32>
    %76 = arith.truncf %75 : vector<4x24x8xf32> to vector<4x24x8xbf16>
    %77 = vector.extract_strided_slice %38 {offsets = [0, 0, 0], sizes = [1, 32, 8], strides = [1, 1, 1]} : vector<4x32x8xbf16> to vector<1x32x8xbf16>
    %78 = vector.shape_cast %77 : vector<1x32x8xbf16> to vector<32x8xbf16>
    %cst_37 = arith.constant dense<0.000000e+00> : vector<24x8xf32>
    %79 = tpu.matmul %32, %78, %cst_37 {dimension_numbers = #tpu.dot_dimension_numbers<[1], [0], [0], [1], [0, 0, 1, 1], [], []>} : vector<24x32xbf16>, vector<32x8xbf16>, vector<24x8xf32> -> vector<24x8xf32>
    %80 = vector.extract_strided_slice %38 {offsets = [1, 0, 0], sizes = [1, 32, 8], strides = [1, 1, 1]} : vector<4x32x8xbf16> to vector<1x32x8xbf16>
    %81 = vector.shape_cast %80 : vector<1x32x8xbf16> to vector<32x8xbf16>
    %cst_38 = arith.constant dense<0.000000e+00> : vector<24x8xf32>
    %82 = tpu.matmul %32, %81, %cst_38 {dimension_numbers = #tpu.dot_dimension_numbers<[1], [0], [0], [1], [0, 0, 1, 1], [], []>} : vector<24x32xbf16>, vector<32x8xbf16>, vector<24x8xf32> -> vector<24x8xf32>
    %83 = vector.extract_strided_slice %38 {offsets = [2, 0, 0], sizes = [1, 32, 8], strides = [1, 1, 1]} : vector<4x32x8xbf16> to vector<1x32x8xbf16>
    %84 = vector.shape_cast %83 : vector<1x32x8xbf16> to vector<32x8xbf16>
    %cst_39 = arith.constant dense<0.000000e+00> : vector<24x8xf32>
    %85 = tpu.matmul %32, %84, %cst_39 {dimension_numbers = #tpu.dot_dimension_numbers<[1], [0], [0], [1], [0, 0, 1, 1], [], []>} : vector<24x32xbf16>, vector<32x8xbf16>, vector<24x8xf32> -> vector<24x8xf32>
    %86 = vector.extract_strided_slice %38 {offsets = [3, 0, 0], sizes = [1, 32, 8], strides = [1, 1, 1]} : vector<4x32x8xbf16> to vector<1x32x8xbf16>
    %87 = vector.shape_cast %86 : vector<1x32x8xbf16> to vector<32x8xbf16>
    %cst_40 = arith.constant dense<0.000000e+00> : vector<24x8xf32>
    %88 = tpu.matmul %32, %87, %cst_40 {dimension_numbers = #tpu.dot_dimension_numbers<[1], [0], [0], [1], [0, 0, 1, 1], [], []>} : vector<24x32xbf16>, vector<32x8xbf16>, vector<24x8xf32> -> vector<24x8xf32>
    %89 = vector.shape_cast %79 : vector<24x8xf32> to vector<1x24x8xf32>
    %90 = vector.shape_cast %82 : vector<24x8xf32> to vector<1x24x8xf32>
    %91 = vector.shape_cast %85 : vector<24x8xf32> to vector<1x24x8xf32>
    %92 = vector.shape_cast %88 : vector<24x8xf32> to vector<1x24x8xf32>
    %93 = tpu.concatenate %89, %90, %91, %92 in 0 : vector<1x24x8xf32>, vector<1x24x8xf32>, vector<1x24x8xf32>, vector<1x24x8xf32> -> vector<4x24x8xf32>
    %94 = arith.truncf %93 : vector<4x24x8xf32> to vector<4x24x8xbf16>
    "tpu.trace_start"() <{level = 10 : i32, message = "hqd,hkd->hqk"}> : () -> ()
    %cst_41 = arith.constant dense<0.000000e+00> : vector<4x24x24xf32>
    %95 = tpu.matmul %58, %76, %cst_41 {dimension_numbers = #tpu.dot_dimension_numbers<[2], [2], [1], [1], [0, 0, 0, 1, 1, 1], [0], [0]>} : vector<4x24x8xbf16>, vector<4x24x8xbf16>, vector<4x24x24xf32> -> vector<4x24x24xf32>
    "tpu.trace_stop"() : () -> ()
    %96 = tpu.iota {dimensions = array<i32: 1>} : vector<1x24xi32>
    %c17_i32 = arith.constant 17 : i32
    %97 = vector.broadcast %c17_i32 : i32 to vector<1x24xi32>
    %98 = arith.cmpi sge, %96, %97 : vector<1x24xi32>
    %cst_42 = arith.constant -1.000000e+30 : f32
    %99 = vector.shape_cast %98 : vector<1x24xi1> to vector<1x1x24xi1>
    %100 = vector.broadcast %99 : vector<1x1x24xi1> to vector<4x24x24xi1>
    %101 = vector.broadcast %cst_42 : f32 to vector<4x24x24xf32>
    %102 = arith.select %100, %101, %95 : vector<4x24x24xi1>, vector<4x24x24xf32>
    %cst_43 = arith.constant dense<0xFF800000> : vector<4x24xf32>
    %103 = vector.multi_reduction <maximumf>, %102, %cst_43 [2] : vector<4x24x24xf32> to vector<4x24xf32>
    %104 = vector.shape_cast %103 : vector<4x24xf32> to vector<4x24x1xf32>
    %105 = vector.broadcast %104 : vector<4x24x1xf32> to vector<4x24x24xf32>
    %106 = arith.subf %102, %105 : vector<4x24x24xf32>
    %107 = math.exp %106 : vector<4x24x24xf32>
    %cst_44 = arith.constant dense<0.000000e+00> : vector<4x24xf32>
    %108 = vector.multi_reduction <add>, %107, %cst_44 [2] : vector<4x24x24xf32> to vector<4x24xf32>
    %109 = vector.shape_cast %108 : vector<4x24xf32> to vector<4x24x1xf32>
    %110 = tpu.reciprocal %109 {approx = true} : vector<4x24x1xf32> -> vector<4x24x1xf32>
    %111 = vector.broadcast %110 : vector<4x24x1xf32> to vector<4x24x24xf32>
    %112 = arith.mulf %107, %111 : vector<4x24x24xf32>
    %113 = arith.truncf %112 : vector<4x24x24xf32> to vector<4x24x24xbf16>
    "tpu.trace_start"() <{level = 10 : i32, message = "hqk,hkd->hqd"}> : () -> ()
    %cst_45 = arith.constant dense<0.000000e+00> : vector<4x24x8xf32>
    %114 = tpu.matmul %113, %94, %cst_45 {dimension_numbers = #tpu.dot_dimension_numbers<[2], [1], [1], [2], [0, 0, 0, 1, 1, 2], [0], [0]>} : vector<4x24x24xbf16>, vector<4x24x8xbf16>, vector<4x24x8xf32> -> vector<4x24x8xf32>
    "tpu.trace_stop"() : () -> ()
    %c0_46 = arith.constant 0 : index
    %c0_47 = arith.constant 0 : index
    %c0_48 = arith.constant 0 : index
    %115 = vector.load %arg9[%c0_46, %c0_47, %c0_48] : memref<1x1x32xf32, #tpu.memory_space<vmem>>, vector<1x1x32xf32>
    %116 = vector.shape_cast %115 : vector<1x1x32xf32> to vector<1x32xf32>
    %117 = vector.extract_strided_slice %114 {offsets = [0, 0, 0], sizes = [1, 24, 8], strides = [1, 1, 1]} : vector<4x24x8xf32> to vector<1x24x8xf32>
    %118 = vector.shape_cast %117 : vector<1x24x8xf32> to vector<24x8xf32>
    %119 = arith.truncf %118 : vector<24x8xf32> to vector<24x8xbf16>
    %120 = vector.extract_strided_slice %40 {offsets = [0, 0, 0], sizes = [1, 8, 32], strides = [1, 1, 1]} : vector<4x8x32xbf16> to vector<1x8x32xbf16>
    %121 = vector.shape_cast %120 : vector<1x8x32xbf16> to vector<8x32xbf16>
    %cst_49 = arith.constant dense<0.000000e+00> : vector<24x32xf32>
    %122 = tpu.matmul %119, %121, %cst_49 {dimension_numbers = #tpu.dot_dimension_numbers<[1], [0], [0], [1], [0, 0, 1, 1], [], []>} : vector<24x8xbf16>, vector<8x32xbf16>, vector<24x32xf32> -> vector<24x32xf32>
    %123 = vector.broadcast %116 : vector<1x32xf32> to vector<24x32xf32>
    %124 = arith.addf %123, %122 : vector<24x32xf32>
    %125 = vector.extract_strided_slice %114 {offsets = [1, 0, 0], sizes = [1, 24, 8], strides = [1, 1, 1]} : vector<4x24x8xf32> to vector<1x24x8xf32>
    %126 = vector.shape_cast %125 : vector<1x24x8xf32> to vector<24x8xf32>
    %127 = arith.truncf %126 : vector<24x8xf32> to vector<24x8xbf16>
    %128 = vector.extract_strided_slice %40 {offsets = [1, 0, 0], sizes = [1, 8, 32], strides = [1, 1, 1]} : vector<4x8x32xbf16> to vector<1x8x32xbf16>
    %129 = vector.shape_cast %128 : vector<1x8x32xbf16> to vector<8x32xbf16>
    %cst_50 = arith.constant dense<0.000000e+00> : vector<24x32xf32>
    %130 = tpu.matmul %127, %129, %cst_50 {dimension_numbers = #tpu.dot_dimension_numbers<[1], [0], [0], [1], [0, 0, 1, 1], [], []>} : vector<24x8xbf16>, vector<8x32xbf16>, vector<24x32xf32> -> vector<24x32xf32>
    %131 = arith.addf %124, %130 : vector<24x32xf32>
    %132 = vector.extract_strided_slice %114 {offsets = [2, 0, 0], sizes = [1, 24, 8], strides = [1, 1, 1]} : vector<4x24x8xf32> to vector<1x24x8xf32>
    %133 = vector.shape_cast %132 : vector<1x24x8xf32> to vector<24x8xf32>
    %134 = arith.truncf %133 : vector<24x8xf32> to vector<24x8xbf16>
    %135 = vector.extract_strided_slice %40 {offsets = [2, 0, 0], sizes = [1, 8, 32], strides = [1, 1, 1]} : vector<4x8x32xbf16> to vector<1x8x32xbf16>
    %136 = vector.shape_cast %135 : vector<1x8x32xbf16> to vector<8x32xbf16>
    %cst_51 = arith.constant dense<0.000000e+00> : vector<24x32xf32>
    %137 = tpu.matmul %134, %136, %cst_51 {dimension_numbers = #tpu.dot_dimension_numbers<[1], [0], [0], [1], [0, 0, 1, 1], [], []>} : vector<24x8xbf16>, vector<8x32xbf16>, vector<24x32xf32> -> vector<24x32xf32>
    %138 = arith.addf %131, %137 : vector<24x32xf32>
    %139 = vector.extract_strided_slice %114 {offsets = [3, 0, 0], sizes = [1, 24, 8], strides = [1, 1, 1]} : vector<4x24x8xf32> to vector<1x24x8xf32>
    %140 = vector.shape_cast %139 : vector<1x24x8xf32> to vector<24x8xf32>
    %141 = arith.truncf %140 : vector<24x8xf32> to vector<24x8xbf16>
    %142 = vector.extract_strided_slice %40 {offsets = [3, 0, 0], sizes = [1, 8, 32], strides = [1, 1, 1]} : vector<4x8x32xbf16> to vector<1x8x32xbf16>
    %143 = vector.shape_cast %142 : vector<1x8x32xbf16> to vector<8x32xbf16>
    %cst_52 = arith.constant dense<0.000000e+00> : vector<24x32xf32>
    %144 = tpu.matmul %141, %143, %cst_52 {dimension_numbers = #tpu.dot_dimension_numbers<[1], [0], [0], [1], [0, 0, 1, 1], [], []>} : vector<24x8xbf16>, vector<8x32xbf16>, vector<24x32xf32> -> vector<24x32xf32>
    %145 = arith.addf %138, %144 : vector<24x32xf32>
    %146 = arith.addf %5, %145 : vector<24x32xf32>
    %c0_53 = arith.constant 0 : index
    %c0_54 = arith.constant 0 : index
    %c0_55 = arith.constant 0 : index
    %147 = vector.load %arg10[%c0_53, %c0_54, %c0_55] : memref<1x1x32xf32, #tpu.memory_space<vmem>>, vector<1x1x32xf32>
    %148 = vector.shape_cast %147 : vector<1x1x32xf32> to vector<1x32xf32>
    %c0_56 = arith.constant 0 : index
    %c0_57 = arith.constant 0 : index
    %c0_58 = arith.constant 0 : index
    %149 = vector.load %arg11[%c0_56, %c0_57, %c0_58] : memref<1x1x32xf32, #tpu.memory_space<vmem>>, vector<1x1x32xf32>
    %150 = vector.shape_cast %149 : vector<1x1x32xf32> to vector<1x32xf32>
    %cst_59 = arith.constant dense<0.000000e+00> : vector<24xf32>
    %151 = vector.multi_reduction <add>, %146, %cst_59 [1] : vector<24x32xf32> to vector<24xf32>
    %152 = vector.shape_cast %151 : vector<24xf32> to vector<24x1xf32>
    %cst_60 = arith.constant 3.200000e+01 : f32
    %153 = vector.broadcast %cst_60 : f32 to vector<24x1xf32>
    %154 = arith.divf %152, %153 : vector<24x1xf32>
    %155 = vector.broadcast %154 : vector<24x1xf32> to vector<24x32xf32>
    %156 = arith.subf %146, %155 : vector<24x32xf32>
    %157 = arith.mulf %156, %156 : vector<24x32xf32>
    %cst_61 = arith.constant dense<0.000000e+00> : vector<24xf32>
    %158 = vector.multi_reduction <add>, %157, %cst_61 [1] : vector<24x32xf32> to vector<24xf32>
    %159 = vector.shape_cast %158 : vector<24xf32> to vector<24x1xf32>
    %cst_62 = arith.constant 3.200000e+01 : f32
    %160 = vector.broadcast %cst_62 : f32 to vector<24x1xf32>
    %161 = arith.divf %159, %160 : vector<24x1xf32>
    %162 = vector.broadcast %154 : vector<24x1xf32> to vector<24x32xf32>
    %163 = arith.subf %146, %162 : vector<24x32xf32>
    %cst_63 = arith.constant 9.99999974E-6 : f32
    %164 = vector.broadcast %cst_63 : f32 to vector<24x1xf32>
    %165 = arith.addf %161, %164 : vector<24x1xf32>
    %166 = math.rsqrt %165 : vector<24x1xf32>
    %167 = vector.broadcast %166 : vector<24x1xf32> to vector<24x32xf32>
    %168 = arith.mulf %163, %167 : vector<24x32xf32>
    %169 = vector.broadcast %148 : vector<1x32xf32> to vector<24x32xf32>
    %170 = arith.mulf %168, %169 : vector<24x32xf32>
    %171 = vector.broadcast %150 : vector<1x32xf32> to vector<24x32xf32>
    %172 = arith.addf %170, %171 : vector<24x32xf32>
    %173 = arith.truncf %172 : vector<24x32xf32> to vector<24x32xbf16>
    %c0_64 = arith.constant 0 : index
    %c0_65 = arith.constant 0 : index
    %c0_66 = arith.constant 0 : index
    %174 = vector.load %arg12[%c0_64, %c0_65, %c0_66] : memref<1x32x64xbf16, #tpu.memory_space<vmem>>, vector<1x32x64xbf16>
    %175 = vector.shape_cast %174 : vector<1x32x64xbf16> to vector<32x64xbf16>
    %cst_67 = arith.constant dense<0.000000e+00> : vector<24x64xf32>
    %176 = tpu.matmul %173, %175, %cst_67 {dimension_numbers = #tpu.dot_dimension_numbers<[1], [0], [0], [1], [0, 0, 1, 1], [], []>} : vector<24x32xbf16>, vector<32x64xbf16>, vector<24x64xf32> -> vector<24x64xf32>
    %c0_68 = arith.constant 0 : index
    %c0_69 = arith.constant 0 : index
    %c0_70 = arith.constant 0 : index
    %177 = vector.load %arg13[%c0_68, %c0_69, %c0_70] : memref<1x1x64xf32, #tpu.memory_space<vmem>>, vector<1x1x64xf32>
    %178 = vector.shape_cast %177 : vector<1x1x64xf32> to vector<1x64xf32>
    %179 = vector.broadcast %178 : vector<1x64xf32> to vector<24x64xf32>
    %180 = arith.addf %176, %179 : vector<24x64xf32>
    %cst_71 = arith.constant 5.000000e-01 : f32
    %181 = vector.broadcast %cst_71 : f32 to vector<24x64xf32>
    %182 = arith.mulf %181, %180 : vector<24x64xf32>
    %cst_72 = arith.constant 0.707106769 : f32
    %183 = vector.broadcast %cst_72 : f32 to vector<24x64xf32>
    %184 = arith.mulf %180, %183 : vector<24x64xf32>
    %185 = math.erf %184 : vector<24x64xf32>
    %cst_73 = arith.constant 1.000000e+00 : f32
    %186 = vector.broadcast %cst_73 : f32 to vector<24x64xf32>
    %187 = arith.addf %186, %185 : vector<24x64xf32>
    %188 = arith.mulf %182, %187 : vector<24x64xf32>
    %189 = arith.truncf %188 : vector<24x64xf32> to vector<24x64xbf16>
    %c0_74 = arith.constant 0 : index
    %c0_75 = arith.constant 0 : index
    %c0_76 = arith.constant 0 : index
    %190 = vector.load %arg14[%c0_74, %c0_75, %c0_76] : memref<1x64x32xbf16, #tpu.memory_space<vmem>>, vector<1x64x32xbf16>
    %191 = vector.shape_cast %190 : vector<1x64x32xbf16> to vector<64x32xbf16>
    %cst_77 = arith.constant dense<0.000000e+00> : vector<24x32xf32>
    %192 = tpu.matmul %189, %191, %cst_77 {dimension_numbers = #tpu.dot_dimension_numbers<[1], [0], [0], [1], [0, 0, 1, 1], [], []>} : vector<24x64xbf16>, vector<64x32xbf16>, vector<24x32xf32> -> vector<24x32xf32>
    %c0_78 = arith.constant 0 : index
    %c0_79 = arith.constant 0 : index
    %c0_80 = arith.constant 0 : index
    %193 = vector.load %arg15[%c0_78, %c0_79, %c0_80] : memref<1x1x32xf32, #tpu.memory_space<vmem>>, vector<1x1x32xf32>
    %194 = vector.shape_cast %193 : vector<1x1x32xf32> to vector<1x32xf32>
    %195 = vector.broadcast %194 : vector<1x32xf32> to vector<24x32xf32>
    %196 = arith.addf %192, %195 : vector<24x32xf32>
    %197 = arith.addf %146, %196 : vector<24x32xf32>
    %198 = arith.truncf %197 : vector<24x32xf32> to vector<24x32xbf16>
    %c0_81 = arith.constant 0 : index
    %c0_82 = arith.constant 0 : index
    %c0_83 = arith.constant 0 : index
    %199 = vector.load %arg16[%c0_81, %c0_82, %c0_83] : memref<1x24x32xbf16, #tpu.memory_space<vmem>>, vector<1x24x32xbf16>
    %200 = vector.shape_cast %199 : vector<1x24x32xbf16> to vector<24x32xbf16>
    %201 = vector.shape_cast %198 : vector<24x32xbf16> to vector<1x24x32xbf16>
    tpu.vector_store %arg16[%c0_81, %c0_82, %c0_83], %201 {strides = array<i32>} : memref<1x24x32xbf16, #tpu.memory_space<vmem>>, vector<1x24x32xbf16>,
    return
  }
  func.func @transform_0(%arg0: i32, %arg1: i32) -> (i32, i32, i32) {
    %c0_i32 = arith.constant 0 : i32
    %c0_i32_0 = arith.constant 0 : i32
    %c0_i32_1 = arith.constant 0 : i32
    return %arg0, %c0_i32, %c0_i32_0 : i32, i32, i32
  }
  func.func @transform_1(%arg0: i32, %arg1: i32) -> (i32, i32, i32) {
    %c0_i32 = arith.constant 0 : i32
    %c0_i32_0 = arith.constant 0 : i32
    %c0_i32_1 = arith.constant 0 : i32
    return %arg1, %c0_i32, %c0_i32_0 : i32, i32, i32
  }
  func.func @transform_2(%arg0: i32, %arg1: i32) -> (i32, i32, i32) {
    %c0_i32 = arith.constant 0 : i32
    %c0_i32_0 = arith.constant 0 : i32
    %c0_i32_1 = arith.constant 0 : i32
    return %arg1, %c0_i32, %c0_i32_0 : i32, i32, i32
  }
  func.func @transform_3(%arg0: i32, %arg1: i32) -> (i32, i32, i32, i32) {
    %c0_i32 = arith.constant 0 : i32
    %c0_i32_0 = arith.constant 0 : i32
    %c0_i32_1 = arith.constant 0 : i32
    %c0_i32_2 = arith.constant 0 : i32
    return %arg1, %c0_i32, %c0_i32_0, %c0_i32_1 : i32, i32, i32, i32
  }
  func.func @transform_4(%arg0: i32, %arg1: i32) -> (i32, i32, i32, i32) {
    %c0_i32 = arith.constant 0 : i32
    %c0_i32_0 = arith.constant 0 : i32
    %c0_i32_1 = arith.constant 0 : i32
    %c0_i32_2 = arith.constant 0 : i32
    return %arg1, %c0_i32, %c0_i32_0, %c0_i32_1 : i32, i32, i32, i32
  }
  func.func @transform_5(%arg0: i32, %arg1: i32) -> (i32, i32, i32, i32) {
    %c0_i32 = arith.constant 0 : i32
    %c0_i32_0 = arith.constant 0 : i32
    %c0_i32_1 = arith.constant 0 : i32
    %c0_i32_2 = arith.constant 0 : i32
    return %arg1, %c0_i32, %c0_i32_0, %c0_i32_1 : i32, i32, i32, i32
  }
  func.func @transform_6(%arg0: i32, %arg1: i32) -> (i32, i32, i32, i32) {
    %c0_i32 = arith.constant 0 : i32
    %c0_i32_0 = arith.constant 0 : i32
    %c0_i32_1 = arith.constant 0 : i32
    %c0_i32_2 = arith.constant 0 : i32
    return %arg1, %c0_i32, %c0_i32_0, %c0_i32_1 : i32, i32, i32, i32
  }
  func.func @transform_7(%arg0: i32, %arg1: i32) -> (i32, i32, i32) {
    %c0_i32 = arith.constant 0 : i32
    %c0_i32_0 = arith.constant 0 : i32
    %c0_i32_1 = arith.constant 0 : i32
    return %arg1, %c0_i32, %c0_i32_0 : i32, i32, i32
  }
  func.func @transform_8(%arg0: i32, %arg1: i32) -> (i32, i32, i32) {
    %c0_i32 = arith.constant 0 : i32
    %c0_i32_0 = arith.constant 0 : i32
    %c0_i32_1 = arith.constant 0 : i32
    return %arg1, %c0_i32, %c0_i32_0 : i32, i32, i32
  }
  func.func @transform_9(%arg0: i32, %arg1: i32) -> (i32, i32, i32) {
    %c0_i32 = arith.constant 0 : i32
    %c0_i32_0 = arith.constant 0 : i32
    %c0_i32_1 = arith.constant 0 : i32
    return %arg1, %c0_i32, %c0_i32_0 : i32, i32, i32
  }
  func.func @transform_10(%arg0: i32, %arg1: i32) -> (i32, i32, i32) {
    %c0_i32 = arith.constant 0 : i32
    %c0_i32_0 = arith.constant 0 : i32
    %c0_i32_1 = arith.constant 0 : i32
    return %arg1, %c0_i32, %c0_i32_0 : i32, i32, i32
  }
  func.func @transform_11(%arg0: i32, %arg1: i32) -> (i32, i32, i32) {
    %c0_i32 = arith.constant 0 : i32
    %c0_i32_0 = arith.constant 0 : i32
    %c0_i32_1 = arith.constant 0 : i32
    return %arg1, %c0_i32, %c0_i32_0 : i32, i32, i32
  }
  func.func @transform_12(%arg0: i32, %arg1: i32) -> (i32, i32, i32) {
    %c0_i32 = arith.constant 0 : i32
    %c0_i32_0 = arith.constant 0 : i32
    %c0_i32_1 = arith.constant 0 : i32
    return %arg1, %c0_i32, %c0_i32_0 : i32, i32, i32
  }
  func.func @transform_13(%arg0: i32, %arg1: i32) -> (i32, i32, i32) {
    %c0_i32 = arith.constant 0 : i32
    %c0_i32_0 = arith.constant 0 : i32
    %c0_i32_1 = arith.constant 0 : i32
    return %arg1, %c0_i32, %c0_i32_0 : i32, i32, i32
  }
  func.func @transform_14(%arg0: i32, %arg1: i32) -> (i32, i32, i32) {
    %c0_i32 = arith.constant 0 : i32
    %c0_i32_0 = arith.constant 0 : i32
    %c0_i32_1 = arith.constant 0 : i32
    return %arg0, %c0_i32, %c0_i32_0 : i32, i32, i32
  }
}

module attributes {stable_mosaic.version = 11 : i64} {
  func.func @head_kernel(%arg0: i32, %arg1: memref<2x32xbf16, #tpu.memory_space<vmem>>, %arg2: memref<1x32xf32, #tpu.memory_space<vmem>>, %arg3: memref<1x32xf32, #tpu.memory_space<vmem>>, %arg4: memref<32x8xbf16, #tpu.memory_space<vmem>>, %arg5: memref<1x8xf32, #tpu.memory_space<vmem>>, %arg6: memref<2x8xf32, #tpu.memory_space<vmem>>) attributes {dimension_semantics = [#tpu.dimension_semantics<arbitrary>], iteration_bounds = array<i64: 1>, scalar_prefetch = 0 : i64, scratch_operands = 0 : i64, tpu.core_type = #tpu.core_type<tc>, window_params = [{pipeline_mode = #tpu.pipeline_mode<synchronous>, transform_indices = @transform_0, window_bounds = array<i64: 2, 32>}, {pipeline_mode = #tpu.pipeline_mode<synchronous>, transform_indices = @transform_1, window_bounds = array<i64: 1, 32>}, {pipeline_mode = #tpu.pipeline_mode<synchronous>, transform_indices = @transform_2, window_bounds = array<i64: 1, 32>}, {pipeline_mode = #tpu.pipeline_mode<synchronous>, transform_indices = @transform_3, window_bounds = array<i64: 32, 8>}, {pipeline_mode = #tpu.pipeline_mode<synchronous>, transform_indices = @transform_4, window_bounds = array<i64: 1, 8>}, {pipeline_mode = #tpu.pipeline_mode<synchronous>, transform_indices = @transform_5, window_bounds = array<i64: 2, 8>}]} {
    %c0 = arith.constant 0 : index
    %c0_0 = arith.constant 0 : index
    %0 = vector.load %arg1[%c0, %c0_0] : memref<2x32xbf16, #tpu.memory_space<vmem>>, vector<2x32xbf16>
    %1 = arith.extf %0 : vector<2x32xbf16> to vector<2x32xf32>
    %c0_1 = arith.constant 0 : index
    %c0_2 = arith.constant 0 : index
    %2 = vector.load %arg2[%c0_1, %c0_2] : memref<1x32xf32, #tpu.memory_space<vmem>>, vector<1x32xf32>
    %c0_3 = arith.constant 0 : index
    %c0_4 = arith.constant 0 : index
    %3 = vector.load %arg3[%c0_3, %c0_4] : memref<1x32xf32, #tpu.memory_space<vmem>>, vector<1x32xf32>
    %cst = arith.constant dense<0.000000e+00> : vector<2xf32>
    %4 = vector.multi_reduction <add>, %1, %cst [1] : vector<2x32xf32> to vector<2xf32>
    %5 = vector.shape_cast %4 : vector<2xf32> to vector<2x1xf32>
    %cst_5 = arith.constant 3.200000e+01 : f32
    %6 = vector.broadcast %cst_5 : f32 to vector<2x1xf32>
    %7 = arith.divf %5, %6 : vector<2x1xf32>
    %8 = vector.broadcast %7 : vector<2x1xf32> to vector<2x32xf32>
    %9 = arith.subf %1, %8 : vector<2x32xf32>
    %10 = arith.mulf %9, %9 : vector<2x32xf32>
    %cst_6 = arith.constant dense<0.000000e+00> : vector<2xf32>
    %11 = vector.multi_reduction <add>, %10, %cst_6 [1] : vector<2x32xf32> to vector<2xf32>
    %12 = vector.shape_cast %11 : vector<2xf32> to vector<2x1xf32>
    %cst_7 = arith.constant 3.200000e+01 : f32
    %13 = vector.broadcast %cst_7 : f32 to vector<2x1xf32>
    %14 = arith.divf %12, %13 : vector<2x1xf32>
    %15 = vector.broadcast %7 : vector<2x1xf32> to vector<2x32xf32>
    %16 = arith.subf %1, %15 : vector<2x32xf32>
    %cst_8 = arith.constant 9.99999974E-6 : f32
    %17 = vector.broadcast %cst_8 : f32 to vector<2x1xf32>
    %18 = arith.addf %14, %17 : vector<2x1xf32>
    %19 = math.rsqrt %18 : vector<2x1xf32>
    %20 = vector.broadcast %19 : vector<2x1xf32> to vector<2x32xf32>
    %21 = arith.mulf %16, %20 : vector<2x32xf32>
    %22 = vector.broadcast %2 : vector<1x32xf32> to vector<2x32xf32>
    %23 = arith.mulf %21, %22 : vector<2x32xf32>
    %24 = vector.broadcast %3 : vector<1x32xf32> to vector<2x32xf32>
    %25 = arith.addf %23, %24 : vector<2x32xf32>
    %26 = arith.truncf %25 : vector<2x32xf32> to vector<2x32xbf16>
    %c0_9 = arith.constant 0 : index
    %c0_10 = arith.constant 0 : index
    %27 = vector.load %arg4[%c0_9, %c0_10] : memref<32x8xbf16, #tpu.memory_space<vmem>>, vector<32x8xbf16>
    %cst_11 = arith.constant dense<0.000000e+00> : vector<2x8xf32>
    %28 = tpu.matmul %26, %27, %cst_11 {dimension_numbers = #tpu.dot_dimension_numbers<[1], [0], [0], [1], [0, 0, 1, 1], [], []>} : vector<2x32xbf16>, vector<32x8xbf16>, vector<2x8xf32> -> vector<2x8xf32>
    %c0_12 = arith.constant 0 : index
    %c0_13 = arith.constant 0 : index
    %29 = vector.load %arg5[%c0_12, %c0_13] : memref<1x8xf32, #tpu.memory_space<vmem>>, vector<1x8xf32>
    %30 = vector.broadcast %29 : vector<1x8xf32> to vector<2x8xf32>
    %31 = arith.addf %28, %30 : vector<2x8xf32>
    %c0_14 = arith.constant 0 : index
    %c0_15 = arith.constant 0 : index
    %32 = vector.load %arg6[%c0_14, %c0_15] : memref<2x8xf32, #tpu.memory_space<vmem>>, vector<2x8xf32>
    tpu.vector_store %arg6[%c0_14, %c0_15], %31 {strides = array<i32>} : memref<2x8xf32, #tpu.memory_space<vmem>>, vector<2x8xf32>,
    return
  }
  func.func @transform_0(%arg0: i32) -> (i32, i32) {
    %c0_i32 = arith.constant 0 : i32
    %c0_i32_0 = arith.constant 0 : i32
    %c0_i32_1 = arith.constant 0 : i32
    return %c0_i32, %c0_i32_0 : i32, i32
  }
  func.func @transform_1(%arg0: i32) -> (i32, i32) {
    %c0_i32 = arith.constant 0 : i32
    %c0_i32_0 = arith.constant 0 : i32
    %c0_i32_1 = arith.constant 0 : i32
    return %c0_i32, %c0_i32_0 : i32, i32
  }
  func.func @transform_2(%arg0: i32) -> (i32, i32) {
    %c0_i32 = arith.constant 0 : i32
    %c0_i32_0 = arith.constant 0 : i32
    %c0_i32_1 = arith.constant 0 : i32
    return %c0_i32, %c0_i32_0 : i32, i32
  }
  func.func @transform_3(%arg0: i32) -> (i32, i32) {
    %c0_i32 = arith.constant 0 : i32
    %c0_i32_0 = arith.constant 0 : i32
    %c0_i32_1 = arith.constant 0 : i32
    return %c0_i32, %c0_i32_0 : i32, i32
  }
  func.func @transform_4(%arg0: i32) -> (i32, i32) {
    %c0_i32 = arith.constant 0 : i32
    %c0_i32_0 = arith.constant 0 : i32
    %c0_i32_1 = arith.constant 0 : i32
    return %c0_i32, %c0_i32_0 : i32, i32
  }
  func.func @transform_5(%arg0: i32) -> (i32, i32) {
    %c0_i32 = arith.constant 0 : i32
    %c0_i32_0 = arith.constant 0 : i32
    %c0_i32_1 = arith.constant 0 : i32
    return %c0_i32, %c0_i32_0 : i32, i32
  }
}

</mosaic_0001>

<bundles_post_ra>
// kernel: vit_forward.3
= control target key start
LH: loop header
LB: loop body
LE: loop exit
PB: predicated region body
PF: predicated region fallthrough
CT: control target
= control target key end

     0   :  { %s750_s27 = smov 0   ;;  %s821_s0 = inlined_call_operand.vmem [shape: f32[2,24,64], index: 0, kind: input, shape index: {}]   ;;  %s822_s1 = inlined_call_operand.vmem [shape: f32[1,64], index: 1, kind: input, shape index: {}]   ;;  %s823_s2 = inlined_call_operand.vmem [shape: f32[1,64], index: 2, kind: input, shape index: {}]   ;;  %s824_s3 = inlined_call_operand.vmem [shape: bf16[64,32], index: 3, kind: input, shape index: {}]   ;;  %s825_s4 = inlined_call_operand.vmem [shape: f32[1,32], index: 4, kind: input, shape index: {}]   ;;  %s826_s5 = inlined_call_operand.vmem [shape: f32[1,32], index: 5, kind: input, shape index: {}]   ;;  %s827_s6 = inlined_call_operand.vmem [shape: f32[1,32], index: 6, kind: input, shape index: {}]   ;;  %s828_s7 = inlined_call_operand.vmem [shape: f32[24,32], index: 7, kind: input, shape index: {}]   ;;  %s829_s8 = inlined_call_operand.vmem [shape: bf16[2,24,32], index: 8, kind: output, shape index: {}]  }
   0x1 LB: > { %s627_s28 = sadd.s32 4294967295, %s703_s27   ;;  %p631_p0 = scmp.ge.s32.totalorder %s703_s27, 1  ;;  %s703_s27 = sphi %s750_s27, %s18_s27  }
   0x2   : > { %p262_p1 = scmp.lt.s32.totalorder %s703_s27, 3 }
   0x4   : > { %p263_p2 = pnand %p631_p0, %p262_p1 }
   0x5   : > { %p296_p3 = scmp.lt.s32.totalorder (!%p263_p2), %s627_s28, 1  ;;  %vm312_vm0 = vcmask (!%p263_p2), 523264   ;;  %v681_v21 = vld [vmem:[%s824_s3] sm:$0xff] (!%p263_p2)   ;;  %v682_v22 = vld [vmem:[%s824_s3 + $0x8] sm:$0xff] (!%p263_p2)   ;;  %v683_v23 = vld [vmem:[%s824_s3 + $0x10] sm:$0xff] (!%p263_p2)   ;;  %vm468_vm1 = vcmask (!%p263_p2), 261120  }
   0x6   : > { %266 = sbr.rel (%p263_p2) target bundleno = 876 (0x36c), region = 52  ;;  %659 = vmatprep.subr.bf16.mxu0 (!%p263_p2), %v681_v21  ;;  %v684_v24 = vld [vmem:[%s824_s3 + $0x18] sm:$0xff] (!%p263_p2)   ;;  %v634_v36 = vld [vmem:[%s822_s1] ss:$0 sm:$0xff] (!%p263_p2)  ;;  %vm568_vm4 = vcmask (!%p263_p2), 257024  }
   0x7   : > { %660 = vmatpush3.bf16.msra.mxu0 (!%p263_p2), %v681_v21  ;;  %v635_v42 = vld [vmem:[%s823_s2] ss:$0 sm:$0xff] (!%p263_p2) }
   0x8   : > { %661 = vmatprep.subr.bf16.mxu0 (!%p263_p2), %v682_v22  ;;  %v636_v50 = vld [vmem:[%s825_s4] ss:$0 sm:$0xff] (!%p263_p2) }
   0xb   : > { %662 = vmatpush3.bf16.msra.mxu0 (!%p263_p2), %v682_v22 }
   0xc   : > { %663 = vmatprep.subr.bf16.mxu0 (!%p263_p2), %v683_v23 }
   0xd   : > { %s831_s28 = smov (!%p296_p3, %s627_s28), 1 }
   0xe   : > { %s671_s29 = smul.u32 24, %s831_s28 }
   0xf   : > { %664 = vmatpush3.bf16.msra.mxu0 %v683_v23  ;;  %s672_s9 = smul.u32 12, %s831_s28 }
  0x10   : > { %s300_s10 = scalar_lea.vmem %s821_s0, %s671_s29  ;;  %665 = vmatprep.subr.bf16.mxu0 %v684_v24 }
  0x11   : > { %v307_v0 = vld [vmem:[%s300_s10] sm:$0xff]  ;;  %v309_v1 = vld [vmem:[%s300_s10 + $0x10] sm:$0xff]  ;;  %v308_v2 = vld [vmem:[%s300_s10 + $0x8] sm:$0xff]  ;;  %s305_s28 = scalar_lea.vmem %s829_s8, %s672_s9 }
  0x12   : > { %v313_v3 = vsel %vm312_vm0, %v307_v0, 0.0  ;;  %v319_v4 = vsel %vm312_vm0, %v309_v1, 0.0  ;;  %v316_v5 = vsel %vm312_vm0, %v308_v2, 0.0 }
  0x13   : > { %314 = vadd.xlane.f32.xlu0 %v313_v3  ;;  %320 = vadd.xlane.f32.xlu1 %v319_v4 }
  0x14   : > { %666 = vmatpush3.bf16.msra.mxu0 %v684_v24  ;;  %v643_v24 = vld [vmem:[%s826_s5] ss:$0 sm:$0xff] }
  0x17   : > { %317 = vadd.xlane.f32.xlu0 %v316_v5 }
  0xa0   : > { %v315_v6 = vpop.xlane.xlu0 %314  ;;  %v321_v7 = vpop.xlane.xlu1 %320 }
  0xa1   : > { %v323_v8 = vmul.f32 0.015625, %v315_v6  ;;  %v325_v9 = vmul.f32 0.015625, %v321_v7 }
  0xa3   : > { %v326_v10 = vsub.f32 %v307_v0, %v323_v8  ;;  %v328_v11 = vsub.f32 %v309_v1, %v325_v9 }
  0xa4   : > { %v318_v12 = vpop.xlane.xlu0 %317 }
  0xa5   : > { %v324_v13 = vmul.f32 0.015625, %v318_v12  ;;  %v329_v14 = vmul.f32 %v326_v10, %v326_v10  ;;  %v331_v15 = vmul.f32 %v328_v11, %v328_v11 }
  0xa7   : > { %v327_v16 = vsub.f32 %v308_v2, %v324_v13  ;;  %v332_v17 = vsel %vm312_vm0, %v329_v14, 0.0  ;;  %v338_v18 = vsel %vm312_vm0, %v331_v15, 0.0 }
  0xa8   : > { %333 = vadd.xlane.f32.xlu1 %v332_v17 }
  0xa9   : > { %v330_v19 = vmul.f32 %v327_v16, %v327_v16 }
  0xab   : > { %v335_v20 = vsel %vm312_vm0, %v330_v19, 0.0 }
  0xac   : > { %339 = vadd.xlane.f32.xlu1 %v338_v18  ;;  %336 = vadd.xlane.f32.xlu0 %v335_v20  ;;  %v527_v20 = vlaneseq }
  0xae   : > { %v528_v22 = vshrl.u32 %v527_v20, 7 }
  0xb0   : > { %vm531_vm3 = vcmp.ge.s32.totalorder %v528_v22, 1 }
 0x135   : > { %v334_v25 = vpop.xlane.xlu1 %333 }
 0x136   : > { %v341_v26 = vmul.f32 0.015625, %v334_v25  ;;  %v530_v25 = vadd.s32 16, %v528_v22 }
 0x138   : > { %v344_v27 = vadd.f32 1e-05, %v341_v26  ;;  %vm536_vm2 = vcmp.le.s32.totalorder %v530_v25, 16 }
 0x139   : > { %v340_v28 = vpop.xlane.xlu1 %339  ;;  %v337_v29 = vpop.xlane.xlu0 %336 }
 0x13a   : > { %685 = vrsqrt.f32 %v344_v27  ;;  %v343_v30 = vmul.f32 0.015625, %v340_v28  ;;  %v342_v31 = vmul.f32 0.015625, %v337_v29  ;;  %v644_v28 = vld [vmem:[%s827_s6] ss:$0 sm:$0xff] }
 0x13c   : > { %v346_v32 = vadd.f32 1e-05, %v343_v30  ;;  %v345_v33 = vadd.f32 1e-05, %v342_v31 }
 0x13e   : > { %687 = vrsqrt.f32 %v346_v32 }
 0x13f   : > { %689 = vrsqrt.f32 %v345_v33  ;;  %v551_v33 = vld [vmem:[%s828_s7 + $0x10] sm:$0xff] }
 0x144   : > { %v686_v34 = vpop.eup %685 }
 0x145   : > { %v350_v35 = vmul.f32 %v686_v34, %v326_v10 }
 0x147   : > { %v359_v41 = vmul.f32 %v634_v36, %v350_v35  ;;  %v549_v35 = vld [vmem:[%s828_s7] sm:$0xff] }
 0x148   : > { %v688_v37 = vpop.eup %687 }
 0x149   : > { %v690_v38 = vpop.eup %689  ;;  %v352_v39 = vmul.f32 %v688_v37, %v328_v11  ;;  %v368_v46 = vadd.f32 %v635_v42, %v359_v41 }
 0x14a   : > { %v351_v40 = vmul.f32 %v690_v38, %v327_v16 }
 0x14b   : > { %v361_v43 = vmul.f32 %v634_v36, %v352_v39 }
 0x14c   : > { %v360_v44 = vmul.f32 %v634_v36, %v351_v40 }
 0x14d   : > { %v370_v45 = vadd.f32 %v635_v42, %v361_v43  ;;  %v550_v43 = vld [vmem:[%s828_s7 + $0x8] sm:$0xff] }
 0x14e   : > { %v369_v47 = vadd.f32 %v635_v42, %v360_v44 }
 0x14f   : > { %v372_v48 = vpack.c.bf16 %v370_v45, %v370_v45 }
 0x150   : > { %v371_v49 = vpack.c.bf16 %v369_v47, %v368_v46 }
 0x152   : > { %667 = vmatprep.mubr.msk.bf16.mxu0 %vm312_vm0, %v371_v49 }
 0x153   : > { %668 = vmatmul.mubr.msk.bf16.vlgmr.msra.gmra.mrb[0].mxu0 %vm312_vm0, %v372_v48 }
 0x226   : > { %v669_v51 = vpop.f32.mrb[0].mxu0 }
 0x227   : > { %v461_v52 = vadd.f32 %v669_v51, %v636_v50  ;;  %v452_v53 = vpop.f32.mrb[1].mxu0 }
 0x228   : > { %v453_v54 = vadd.f32 %v636_v50, %v452_v53  ;;  %v670_v55 = vpop.f32.mrb[2].mxu0 }
 0x229   : > { %v455_v56 = vpop.f32.mrb[3].mxu0  ;;  %v475_v57 = vsel %vm468_vm1, %v461_v52, 0.0 }
 0x22a   : > { %v456_v58 = vadd.f32 %v636_v50, %v455_v56  ;;  %476 = vadd.xlane.f32.xlu1 %v475_v57  ;;  %v469_v59 = vsel %vm468_vm1, %v453_v54, 0.0 }
 0x22b   : > { %470 = vadd.xlane.f32.xlu0 %v469_v59 }
 0x22c   : > { %v472_v60 = vsel %vm468_vm1, %v456_v58, 0.0 }
 0x22f   : > { %473 = vadd.xlane.f32.xlu0 %v472_v60 }
 0x2b7   : > { %v477_v61 = vpop.xlane.xlu1 %476 }
 0x2b8   : > { %v481_v62 = vmul.f32 0.03125, %v477_v61  ;;  %v471_v63 = vpop.xlane.xlu0 %470 }
 0x2b9   : > { %v479_v0 = vmul.f32 0.03125, %v471_v63 }
 0x2ba   : > { %v484_v1 = vsub.f32 %v461_v52, %v481_v62 }
 0x2bb   : > { %v482_v2 = vsub.f32 %v453_v54, %v479_v0 }
 0x2bc   : > { %v474_v3 = vpop.xlane.xlu0 %473  ;;  %v487_v4 = vmul.f32 %v484_v1, %v484_v1 }
 0x2bd   : > { %v480_v5 = vmul.f32 0.03125, %v474_v3  ;;  %v485_v6 = vmul.f32 %v482_v2, %v482_v2 }
 0x2be   : > { %v494_v7 = vsel %vm468_vm1, %v487_v4, 0.0 }
 0x2bf   : > { %v483_v8 = vsub.f32 %v456_v58, %v480_v5  ;;  %495 = vadd.xlane.f32.xlu0 %v494_v7  ;;  %v488_v9 = vsel %vm468_vm1, %v485_v6, 0.0 }
 0x2c0   : > { %489 = vadd.xlane.f32.xlu1 %v488_v9 }
 0x2c1   : > { %v486_v10 = vmul.f32 %v483_v8, %v483_v8 }
 0x2c3   : > { %v491_v11 = vsel %vm468_vm1, %v486_v10, 0.0 }
 0x2c4   : > { %492 = vadd.xlane.f32.xlu1 %v491_v11 }
 0x34c   : > { %v496_v12 = vpop.xlane.xlu0 %495 }
 0x34d   : > { %v499_v13 = vmul.f32 0.03125, %v496_v12  ;;  %v490_v14 = vpop.xlane.xlu1 %489 }
 0x34e   : > { %v497_v15 = vmul.f32 0.03125, %v490_v14 }
 0x34f   : > { %v502_v16 = vadd.f32 1e-05, %v499_v13 }
 0x350   : > { %v500_v17 = vadd.f32 1e-05, %v497_v15 }
 0x351   : > { %691 = vrsqrt.f32 %v502_v16  ;;  %v493_v18 = vpop.xlane.xlu1 %492 }
 0x352   : > { %693 = vrsqrt.f32 %v500_v17  ;;  %v498_v19 = vmul.f32 0.03125, %v493_v18 }
 0x354   : > { %v501_v21 = vadd.f32 1e-05, %v498_v19 }
 0x356   : > { %695 = vrsqrt.f32 %v501_v21 }
 0x35b   : > { %v692_v23 = vpop.eup %691 }
 0x35c   : > { %v694_v26 = vpop.eup %693  ;;  %v508_v27 = vmul.f32 %v692_v23, %v484_v1 }
 0x35d   : > { %v506_v29 = vmul.f32 %v694_v26, %v482_v2 }
 0x35e   : > { %v517_v30 = vmul.f32 %v643_v24, %v508_v27 }
 0x35f   : > { %v515_v31 = vmul.f32 %v643_v24, %v506_v29 }
 0x360   : > { %v696_v32 = vpop.eup %695  ;;  %v526_v34 = vadd.f32 %v644_v28, %v517_v30 }
 0x361   : > { %v524_v36 = vadd.f32 %v644_v28, %v515_v31  ;;  %v507_v37 = vmul.f32 %v696_v32, %v483_v8 }
 0x362   : > { %v548_v38 = vsel %vm536_vm2, %v526_v34, 0.0 }
 0x363   : > { %v554_v39 = vadd.f32 %v551_v33, %v548_v38  ;;  %v546_v40 = vsel %vm531_vm3, %v524_v36, 0.0  ;;  %v516_v41 = vmul.f32 %v643_v24, %v507_v37 }
 0x364   : > { %v552_v42 = vadd.f32 %v549_v35, %v546_v40 }
 0x365   : > { %v652_v44 = vpack.c.bf16 %v554_v39, %v554_v39  ;;  %v525_v45 = vadd.f32 %v644_v28, %v516_v41 }
 0x366   : > { %v650_v46 = vpack.c.bf16 %v552_v42, %v552_v42 }
 0x367   : > { %571 = vst.msk [vmem:[%s305_s28 + $0x8] sm:$0xf] %vm568_vm4, %v652_v44  ;;  %v553_v47 = vadd.f32 %v550_v43, %v525_v45 }
 0x368   : > { %569 = vst.msk [vmem:[%s305_s28] sm:$0xf] %vm568_vm4, %v650_v46 }
 0x369   : > { %v651_v48 = vpack.c.bf16 %v553_v47, %v553_v47 }
 0x36b   : > { %570 = vst.msk [vmem:[%s305_s28 + $0x4] sm:$0xf] %vm568_vm4, %v651_v48 }
 0x36c PF: > { %s18_s27 = sadd.s32 1, %s703_s27  }
 0x36d   : > { %p15_p4 = scmp.ge.s32.totalorder %s18_s27, 4  }
 0x36f   :  { %17 = sbr.rel (!%p15_p4) target bundleno = 1 (0x1), region = 82 }

// kernel: vit_forward.5
= control target key start
LH: loop header
LB: loop body
LE: loop exit
PB: predicated region body
PF: predicated region fallthrough
CT: control target
= control target key end

     0   :  { %vm26_vm0 = vcmask 254976   ;;  %s250_s0 = inlined_call_operand.vmem [shape: bf16[2,32], index: 0, kind: input, shape index: {}]   ;;  %s251_s1 = inlined_call_operand.vmem [shape: f32[1,32], index: 1, kind: input, shape index: {}]   ;;  %s252_s2 = inlined_call_operand.vmem [shape: f32[1,32], index: 2, kind: input, shape index: {}]   ;;  %s253_s3 = inlined_call_operand.vmem [shape: bf16[32,8], index: 3, kind: input, shape index: {}]   ;;  %s254_s4 = inlined_call_operand.vmem [shape: f32[1,8], index: 4, kind: input, shape index: {}]   ;;  %s255_s5 = inlined_call_operand.hbm [shape: f32[2,8], index: 5, kind: output, shape index: {}]  }
   0x1   :  { %v22_v0 = vld [vmem:[%s250_s0] sm:$0x1] }
   0x2   :  { %v23_v1 = vunpack.c.l.bf16 %v22_v0 }
   0x3   :  { %10 = vsyncpa [#allocation3], 0  ;;  %v159_v8 = vld [vmem:[%s253_s3] sm:$0xff]   ;;  %v187_v9 = vmov 0.0   ;;  %v160_v10 = vld [vmem:[%s253_s3 + $0x8] sm:$0xff]   ;;  %vm188_vm1 = vmmov 0  }
   0x4   :  { %v27_v2 = vsel %vm26_vm0, %v23_v1, 0.0  ;;  %148 = vmatprep.subr.bf16.mxu0 %v187_v9  ;;  %152 = vmatprep.mubr.msk.bf16.mxu0 %vm188_vm1, %v187_v9  ;;  %v139_v15 = vld [vmem:[%s251_s1] ss:$0 sm:$0xff]  ;;  %vm79_vm2 = vcmask 261120   ;;  %s189_s28 = smov [#allocation2]   ;;  %vm123_vm3 = vcmask 58368  }
   0x5   :  { %28 = vadd.xlane.f32.xlu0 %v27_v2  ;;  %149 = vmatpush3.bf16.msra.mxu0 %v159_v8  ;;  %v140_v17 = vld [vmem:[%s252_s2] ss:$0 sm:$0xff]  ;;  %s131_s29 = sshll.u32 %s189_s28, 4  ;;  %s132_s29 = int_to_ptr.vmem [resolvable:$true] %s131_s29 }
   0x6   :  { %150 = vmatprep.subr.bf16.mxu0 %v187_v9  ;;  %v141_v21 = vld [vmem:[%s254_s4] ss:$0 sm:$0xff]  ;;  %s163_s1 = scalar_lea.vmem %s132_s29, 32  ;;  %p168_p1 = scmp.lt.s32.totalorder %s132_s29, %s132_s29 }
   0x7   :  { %p164_p0 = scmp.ne.s32.totalorder %s132_s29, %s163_s1  ;;  %p169_p2 = scmp.lt.s32.totalorder %s163_s1, %s163_s1 }
   0x9   :  { %151 = vmatpush3.bf16.msra.mxu0 %v160_v10  ;;  %p170_p3 = por %p169_p2, %p168_p1 }
   0xb   :  { %p171_p4 = pnand %p170_p3, %p164_p0 }
  0x92   :  { %v29_v3 = vpop.xlane.xlu0 %28 }
  0x93   :  { %v31_v4 = vmul.f32 0.03125, %v29_v3 }
  0x95   :  { %v32_v5 = vsub.f32 %v23_v1, %v31_v4 }
  0x97   :  { %v33_v6 = vmul.f32 %v32_v5, %v32_v5 }
  0x99   :  { %v34_v7 = vsel %vm26_vm0, %v33_v6, 0.0 }
  0x9a   :  { %35 = vadd.xlane.f32.xlu0 %v34_v7 }
 0x127   :  { %v36_v11 = vpop.xlane.xlu0 %35 }
 0x128   :  { %v37_v12 = vmul.f32 0.03125, %v36_v11 }
 0x12a   :  { %v38_v13 = vadd.f32 1e-05, %v37_v12 }
 0x12c   :  { %161 = vrsqrt.f32 %v38_v13 }
 0x136   :  { %v162_v14 = vpop.eup %161 }
 0x137   :  { %v40_v16 = vmul.f32 %v162_v14, %v32_v5 }
 0x139   :  { %v47_v18 = vmul.f32 %v139_v15, %v40_v16 }
 0x13b   :  { %v54_v19 = vadd.f32 %v140_v17, %v47_v18 }
 0x13d   :  { %v55_v20 = vpack.c.bf16 %v54_v19, %v54_v19 }
 0x13f   :  { %153 = vmatmul.mubr.msk.bf16.vlgmr.msra.gmra.mrb[0].mxu0 %vm79_vm2, %v55_v20 }
 0x212   :  { %v117_v22 = vpop.f32.mrb[0].mxu0 }
 0x213   :  { %v118_v23 = vadd.f32 %v141_v21, %v117_v22  ;;  %v154_v24 = vpop.f32.mrb[1].mxu0 }
 0x214   :  { %v120_v25 = vpop.f32.mrb[2].mxu0 }
 0x215   :  { %v155_v26 = vpop.f32.mrb[3].mxu0  ;;  %124 = vst.msk [vmem:[#allocation2] sm:$0x3] %vm123_vm3, %v118_v23 }
 0x216   :  { %174 = shalt.err (!%p171_p4)
}
 0x217   :  { %s175_s4 = scalar_lea.hbm %s255_s5, 32 }
 0x218   :  { %p176_p5 = scmp.ne.s32.totalorder %s255_s5, %s175_s4  ;;  %p179_p6 = scmp.lt.u32.totalorder %s175_s4, %s255_s5 }
 0x21a   :  { %p181_p7 = pnand %p179_p6, %p176_p5 }
 0x21c   :  { %184 = shalt.err (!%p181_p7)
}
 0x21d   :  { %134 = dma.vmem_to_hbm [thread:$0]  %s132_s29, 32, %s255_s5, [#allocation3]  }
 0x21e   :  { %185 = dma.done.wait [#allocation3], 32  }
 0x21f   :  { %186 = vsyncadd [#allocation3], 4294967264 }
 0x220   :  { %138 = vsyncpa [#allocation3], 1 }

// kernel: vit_forward.4
= control target key start
LH: loop header
LB: loop body
LE: loop exit
PB: predicated region body
PF: predicated region fallthrough
CT: control target
= control target key end

     0   :  { %s3638_s29 = smov 0   ;;  %s3640_s30 = smov 0   ;;  %s4126_s0 = inlined_call_operand.vmem [shape: bf16[2,24,32], index: 0, kind: input, shape index: {}]   ;;  %s4127_s1 = inlined_call_operand.vmem [shape: f32[2,1,32], index: 1, kind: input, shape index: {}]   ;;  %s4128_s2 = inlined_call_operand.vmem [shape: f32[2,1,32], index: 2, kind: input, shape index: {}]   ;;  %s4129_s3 = inlined_call_operand.vmem [shape: bf16[2,4,32,8], index: 3, kind: input, shape index: {}]   ;;  %s4130_s4 = inlined_call_operand.vmem [shape: bf16[2,4,32,8], index: 4, kind: input, shape index: {}]   ;;  %s4131_s5 = inlined_call_operand.vmem [shape: bf16[2,4,32,8], index: 5, kind: input, shape index: {}]   ;;  %s4132_s6 = inlined_call_operand.vmem [shape: bf16[2,4,8,32], index: 6, kind: input, shape index: {}]   ;;  %s4133_s7 = inlined_call_operand.vmem [shape: f32[2,1,32], index: 7, kind: input, shape index: {}]   ;;  %s4134_s8 = inlined_call_operand.vmem [shape: f32[2,1,32], index: 8, kind: input, shape index: {}]   ;;  %s4135_s9 = inlined_call_operand.vmem [shape: f32[2,1,32], index: 9, kind: input, shape index: {}]   ;;  %s4136_s10 = inlined_call_operand.vmem [shape: bf16[2,32,64], index: 10, kind: input, shape index: {}]   ;;  %s4137_s11 = inlined_call_operand.vmem [shape: f32[2,1,64], index: 11, kind: input, shape index: {}]   ;;  %s4138_s12 = inlined_call_operand.vmem [shape: bf16[2,64,32], index: 12, kind: input, shape index: {}]   ;;  %s4139_s13 = inlined_call_operand.vmem [shape: f32[2,1,32], index: 13, kind: input, shape index: {}]   ;;  %s4140_s14 = inlined_call_operand.vmem [shape: bf16[2,24,32], index: 14, kind: output, shape index: {}]  }
   0x1   :  { %4146 = sst [smem:[#allocation9_spill]] %s4126_s0  ;;  %s3642_s15 = smov 0  }
   0x2   :  { %4147 = sst [smem:[#allocation10_spill]] %s4128_s2  ;;  %s3644_s16 = smov 0  }
   0x3   :  { %4148 = sst [smem:[#allocation11_spill]] %s4129_s3  ;;  %s3646_s17 = smov 0  }
   0x4   :  { %4149 = sst [smem:[#allocation12_spill]] %s4130_s4 }
   0x5   :  { %4150 = sst [smem:[#allocation13_spill]] %s4131_s5 }
   0x6   :  { %4151 = sst [smem:[#allocation14_spill]] %s4132_s6 }
   0x7   :  { %4152 = sst [smem:[#allocation15_spill]] %s4140_s14 }
   0x8 LB: > { %4153 = sst [smem:[#allocation2_spill]] %s3545_s29  ;;  %s33_s18 = sadd.s32 1, %s3553_s15  ;;  %s3561_s17 = sphi %s3646_s17, %s24_s17   ;;  %s3557_s16 = sphi %s3644_s16, %s4179_s16   ;;  %s3553_s15 = sphi %s3642_s15, %s4178_s15   ;;  %s3549_s30 = sphi %s3640_s30, %s4177_s30   ;;  %s3545_s29 = sphi %s3638_s29, %s4176_s29  }
   0x9   : > { %4154 = sst [smem:[#allocation3_spill]] %s3553_s15  ;;  %s36_s19 = sadd.s32 1, %s3557_s16 }
   0xa   : > { %4155 = sst [smem:[#allocation4_spill]] %s3557_s16  ;;  %p34_p0 = scmp.ge.s32.totalorder %s33_s18, 2 }
   0xb   : > { %4156 = sst [smem:[#allocation5_spill]] %s3561_s17  ;;  %p2941_p1 = scmp.ge.s32.totalorder %s3561_s17, 1 }
   0xc   : > { %p540_p2 = scmp.lt.s32.totalorder %s3561_s17, 5  ;;  %s4181_s18 = smov (%p34_p0, %s33_s18), 0 }
   0xd   : > { %4157 = sst [smem:[#allocation6_spill]] %s4181_s18  ;;  %s4183_s19 = smov (!%p34_p0, %s36_s19), %s3557_s16 }
   0xe   : > { %p541_p3 = pnand %p2941_p1, %p540_p2  ;;  %p38_p4 = scmp.ge.s32.totalorder %s4183_s19, 2 }
  0x10   : > { %s4185_s19 = smov (%p38_p4, %s4183_s19), 0  ;;  %544 = sbr.rel (%p541_p3) target bundleno = 2394 (0x95a), region = 76 }
  0x11   : > { %4158 = sst [smem:[#allocation7_spill]] %s4185_s19 }
  0x17   : > { %p637_p5 = scmp.lt.s32.totalorder %s3549_s30, 1  ;;  %p642_p6 = scmp.lt.s32.totalorder %s3545_s29, 1 }
  0x18   : > { %s4160_s0 = sld [smem:[#allocation9_spill]]  ;;  %s4161_s3 = sld [smem:[#allocation11_spill]] }
  0x19   : > { %s4187_s30 = smov (!%p637_p5, %s3549_s30), 1  ;;  %s4162_s4 = sld [smem:[#allocation12_spill]] }
  0x1a   : > { %s3672_s20 = scalar_select %p642_p6, %s3545_s29, 1 }
  0x1b   : > { %s3386_s21 = smul.u32 12, %s4187_s30  ;;  %s4163_s5 = sld [smem:[#allocation13_spill]] }
  0x1c   : > { %s3051_s16 = sshll.u32 %s3672_s20, 6  ;;  %s3054_s26 = sshll.u32 %s3672_s20, 4 }
  0x1d   : > { %s4164_s6 = sld [smem:[#allocation14_spill]]  ;;  %s692_s17 = scalar_lea.vmem %s4139_s13, %s3672_s20 }
  0x1e   : > { %s641_s18 = scalar_lea.vmem %s4160_s0, %s3386_s21  ;;  %s3689_s29 = scalar_lea.vmem %s4161_s3, %s3051_s16 }
  0x1f   : > { %s3694_s22 = scalar_lea.vmem %s4162_s4, %s3051_s16  ;;  %s4166_s24 = sld [smem:[#allocation15_spill]] }
  0x21   : > { %s3699_s25 = scalar_lea.vmem %s4163_s5, %s3051_s16  ;;  %s3722_s5 = scalar_lea.vmem %s4136_s10, %s3054_s26 }
  0x23   : > { %s3705_s28 = scalar_lea.vmem %s4164_s6, %s3054_s26  ;;  %s684_s6 = scalar_lea.vmem %s4137_s11, %s3672_s20 }
  0x24   : > { %4165 = sst [smem:[#allocation8_spill]] %s3705_s28  ;;  %s3056_s28 = sshll.u32 %s3672_s20, 5 }
  0x25   : > { %s3736_s14 = scalar_lea.vmem %s4138_s12, %s3056_s28  ;;  %s3741_s16 = scalar_lea.vmem %s4166_s24, %s3386_s21 }
  0x26   : > { %s4167_s26 = sld [smem:[#allocation2_spill]] }
  0x2c   : > { %p2956_p7 = scmp.ne.s32.totalorder %s4167_s26, 0 }
  0x2d   : > { %v703_v0 = vld [vmem:[%s641_s18] sm:$0xf] (!%p2956_p7)  ;;  %vm706_vm0 = vcmask (!%p2956_p7), 257024   ;;  %v704_v1 = vld [vmem:[%s641_s18 + $0x4] sm:$0xf] (!%p2956_p7) }
  0x2e   : > { %702 = sbr.rel (%p2956_p7) target bundleno = 53 (0x35), region = 80  ;;  %707 = vst.msk [vmem:[%s3741_s16] sm:$0xf] (!%p2956_p7), %vm706_vm0, %v703_v0  ;;  %708 = vst.msk [vmem:[%s3741_s16 + $0x4] sm:$0xf] (!%p2956_p7), %vm706_vm0, %v704_v1 }
  0x2f   : > { %v705_v2 = vld [vmem:[%s641_s18 + $0x8] sm:$0xf] (!%p2956_p7) }
  0x30   : > { %709 = vst.msk [vmem:[%s3741_s16 + $0x8] sm:$0xf] (!%p2956_p7), %vm706_vm0, %v705_v2 }
  0x35 PF: > { %v3061_v3 = vld [vmem:[%s3741_s16] sm:$0xff]   ;;  %vm718_vm1 = vcmask 261120   ;;  %v3428_v27 = vld [vmem:[%s3689_s29 + $0x10] sm:$0xff]   ;;  %v3429_v28 = vld [vmem:[%s3689_s29 + $0x8] sm:$0xff]   ;;  %s4168_s28 = scalar_lea.vmem %s4127_s1, %s3672_s20  ;;  %s4169_s27 = sld [smem:[#allocation10_spill]]  ;;  %vm1581_vm2 = vcmask 64512  }
  0x36   : > { %v3749_v5 = vunpack.c.l.bf16 %v3061_v3  ;;  %v3753_v7 = vunpack.c.h.bf16 %v3061_v3  ;;  %v3427_v26 = vld [vmem:[%s3689_s29] sm:$0xff]   ;;  %3174 = vmatprep.subr.bf16.mxu1 %v3428_v27  ;;  %v3430_v29 = vld [vmem:[%s3689_s29 + $0x18] sm:$0xff]   ;;  %v3432_v31 = vld [vmem:[%s3689_s29 + $0x30] sm:$0xff]   ;;  %vm1986_vm3 = vcmask 1043456   ;;  %vm1839_vm5 = vcmask 195584   ;;  %s4172_s0 = scalar_lea.vmem %s4133_s7, %s3672_s20  ;;  %s4173_s2 = scalar_lea.vmem %s4134_s8, %s3672_s20 }
  0x37   : > { %v712_v4 = vld [vmem:[%s3741_s16 + $0x8] sm:$0xf]  ;;  %3166 = vmatprep.subr.bf16.mxu0 %v3427_v26  ;;  %3175 = vmatpush3.bf16.msra.mxu1 %v3428_v27  ;;  %v3431_v30 = vld [vmem:[%s3689_s29 + $0x20] sm:$0xff]   ;;  %v3434_v58 = vld [vmem:[%s3689_s29 + $0x38] sm:$0xff]   ;;  %s4174_s30 = scalar_lea.vmem %s4135_s9, %s3672_s20  ;;  %vm2661_vm6 = vcmask 523264   ;;  %vm2732_vm7 = vcmask 257024  }
  0x38   : > { %v3751_v6 = vunpack.c.l.bf16 %v712_v4  ;;  %v719_v8 = vsel %vm718_vm1, %v3749_v5, 0.0  ;;  %v722_v10 = vsel %vm718_vm1, %v3753_v7, 0.0  ;;  %3167 = vmatpush3.bf16.msra.mxu0 %v3427_v26  ;;  %3176 = vmatprep.subr.bf16.mxu1 %v3430_v29  ;;  %v2957_v43 = vld [vmem:[%s4168_s28] ss:$0 sm:$0xff]  ;;  %v3433_v57 = vld [vmem:[%s3689_s29 + $0x28] sm:$0xff]   ;;  %v3436_v60 = vld [vmem:[%s3694_s22 + $0x10] sm:$0xff]  }
  0x39   : > { %720 = vadd.xlane.f32.xlu0 %v719_v8  ;;  %3168 = vmatprep.subr.bf16.mxu0 %v3429_v28  ;;  %v3435_v59 = vld [vmem:[%s3694_s22] sm:$0xff]   ;;  %v3437_v61 = vld [vmem:[%s3694_s22 + $0x8] sm:$0xff]   ;;  %v3438_v62 = vld [vmem:[%s3694_s22 + $0x18] sm:$0xff]   ;;  %s4171_s29 = sld [smem:[#allocation8_spill]] }
  0x3a   : > { %v725_v9 = vsel %vm718_vm1, %v3751_v6, 0.0  ;;  %v3439_v63 = vld [vmem:[%s3694_s22 + $0x20] sm:$0xff]   ;;  %v3440_v0 = vld [vmem:[%s3694_s22 + $0x30] sm:$0xff]   ;;  %v3441_v1 = vld [vmem:[%s3694_s22 + $0x28] sm:$0xff]  }
  0x3b   : > { %726 = vadd.xlane.f32.xlu1 %v725_v9  ;;  %3177 = vmatpush3.bf16.msra.mxu1 %v3430_v29  ;;  %s4170_s19 = scalar_lea.vmem %s4169_s27, %s3672_s20  ;;  %v3442_v2 = vld [vmem:[%s3694_s22 + $0x38] sm:$0xff]   ;;  %v3443_v3 = vld [vmem:[%s3699_s25] sm:$0xff]   ;;  %v3444_v4 = vld [vmem:[%s3699_s25 + $0x10] sm:$0xff]  }
  0x3c   : > { %3169 = vmatpush3.bf16.msra.mxu0 %v3429_v28  ;;  %3190 = vmatprep.subr.bf16.mxu1 %v3432_v31  ;;  %v2958_v49 = vld [vmem:[%s4170_s19] ss:$0 sm:$0xff]  ;;  %v3445_v8 = vld [vmem:[%s3699_s25 + $0x8] sm:$0xff]   ;;  %v3446_v9 = vld [vmem:[%s3699_s25 + $0x18] sm:$0xff]  }
  0x3d   : > { %723 = vadd.xlane.f32.xlu0 %v722_v10  ;;  %3182 = vmatprep.subr.bf16.mxu0 %v3431_v30  ;;  %v3447_v10 = vld [vmem:[%s3699_s25 + $0x20] sm:$0xff]  }
  0xc6   : > { %v721_v11 = vpop.xlane.xlu0 %720 }
  0xc7   : > { %v729_v13 = vmul.f32 0.03125, %v721_v11  ;;  %v3448_v11 = vld [vmem:[%s3699_s25 + $0x30] sm:$0xff]  }
  0xc8   : > { %v727_v12 = vpop.xlane.xlu1 %726 }
  0xc9   : > { %v731_v14 = vmul.f32 0.03125, %v727_v12  ;;  %v732_v15 = vsub.f32 %v3749_v5, %v729_v13  ;;  %v3449_v12 = vld [vmem:[%s3699_s25 + $0x28] sm:$0xff]   ;;  %v3450_v13 = vld [vmem:[%s3699_s25 + $0x38] sm:$0xff]  }
  0xca   : > { %v724_v17 = vpop.xlane.xlu0 %723 }
  0xcb   : > { %v734_v16 = vsub.f32 %v3751_v6, %v731_v14  ;;  %v730_v18 = vmul.f32 0.03125, %v724_v17  ;;  %v735_v19 = vmul.f32 %v732_v15, %v732_v15 }
  0xcd   : > { %v737_v20 = vmul.f32 %v734_v16, %v734_v16  ;;  %v733_v21 = vsub.f32 %v3753_v7, %v730_v18  ;;  %v738_v22 = vsel %vm718_vm1, %v735_v19, 0.0 }
  0xce   : > { %739 = vadd.xlane.f32.xlu1 %v738_v22 }
  0xcf   : > { %v744_v23 = vsel %vm718_vm1, %v737_v20, 0.0  ;;  %v736_v24 = vmul.f32 %v733_v21, %v733_v21 }
  0xd1   : > { %v741_v25 = vsel %vm718_vm1, %v736_v24, 0.0 }
  0xd2   : > { %745 = vadd.xlane.f32.xlu1 %v744_v23  ;;  %742 = vadd.xlane.f32.xlu0 %v741_v25 }
 0x15b   : > { %v740_v32 = vpop.xlane.xlu1 %739 }
 0x15c   : > { %v747_v33 = vmul.f32 0.03125, %v740_v32 }
 0x15e   : > { %v750_v34 = vadd.f32 1e-05, %v747_v33 }
 0x15f   : > { %v746_v35 = vpop.xlane.xlu1 %745  ;;  %v743_v36 = vpop.xlane.xlu0 %742 }
 0x160   : > { %3457 = vrsqrt.f32 %v750_v34  ;;  %v749_v37 = vmul.f32 0.03125, %v746_v35  ;;  %v748_v38 = vmul.f32 0.03125, %v743_v36 }
 0x162   : > { %v752_v39 = vadd.f32 1e-05, %v749_v37  ;;  %v751_v40 = vadd.f32 1e-05, %v748_v38 }
 0x164   : > { %3459 = vrsqrt.f32 %v752_v39 }
 0x165   : > { %3461 = vrsqrt.f32 %v751_v40 }
 0x16a   : > { %v3458_v41 = vpop.eup %3457 }
 0x16b   : > { %v756_v42 = vmul.f32 %v3458_v41, %v732_v15 }
 0x16d   : > { %v765_v47 = vmul.f32 %v2957_v43, %v756_v42 }
 0x16e   : > { %v3460_v44 = vpop.eup %3459 }
 0x16f   : > { %v3462_v45 = vpop.eup %3461  ;;  %v758_v46 = vmul.f32 %v3460_v44, %v734_v16  ;;  %v774_v53 = vadd.f32 %v2958_v49, %v765_v47 }
 0x170   : > { %v757_v48 = vmul.f32 %v3462_v45, %v733_v21 }
 0x171   : > { %v767_v50 = vmul.f32 %v2957_v43, %v758_v46 }
 0x172   : > { %v766_v51 = vmul.f32 %v2957_v43, %v757_v48 }
 0x173   : > { %v776_v52 = vadd.f32 %v2958_v49, %v767_v50 }
 0x174   : > { %v775_v54 = vadd.f32 %v2958_v49, %v766_v51 }
 0x175   : > { %v3783_v55 = vpack.c.bf16 %v776_v52, %v776_v52 }
 0x176   : > { %v3785_v56 = vpack.c.bf16 %v775_v54, %v774_v53 }
 0x178   : > { %3170 = vmatprep.mubr.msk.bf16.mxu0 %vm718_vm1, %v3785_v56  ;;  %3178 = vmatprep.mubr.msk.bf16.mxu1 %vm718_vm1, %v3785_v56 }
 0x179   : > { %3171 = vmatmul.mubr.msk.bf16.vlgmr.msra.gmra.mrb[0].mxu0 %vm718_vm1, %v3783_v55  ;;  %3179 = vmatmul.mubr.msk.bf16.vlgmr.msra.gmra.mrb[0].mxu1 %vm718_vm1, %v3783_v55 }
 0x17a   : > { %3183 = vmatpush3.bf16.msra.mxu0 %v3431_v30  ;;  %3191 = vmatpush3.bf16.msra.mxu1 %v3432_v31 }
 0x17b   : > { %3186 = vmatprep.mubr.msk.bf16.mxu0 %vm718_vm1, %v3785_v56  ;;  %3194 = vmatprep.mubr.msk.bf16.mxu1 %vm718_vm1, %v3785_v56 }
 0x17c   : > { %3184 = vmatprep.subr.bf16.mxu0 %v3433_v57  ;;  %3192 = vmatprep.subr.bf16.mxu1 %v3434_v58 }
 0x17e   : > { %3185 = vmatpush3.bf16.msra.mxu0 %v3433_v57  ;;  %3193 = vmatpush3.bf16.msra.mxu1 %v3434_v58 }
 0x17f   : > { %3198 = vmatprep.subr.bf16.mxu0 %v3435_v59  ;;  %3206 = vmatprep.subr.bf16.mxu1 %v3436_v60 }
 0x181   : > { %3187 = vmatmul.mubr.msk.bf16.vlgmr.msra.gmra.mrb[4].mxu0 %vm718_vm1, %v3783_v55  ;;  %3195 = vmatmul.mubr.msk.bf16.vlgmr.msra.gmra.mrb[4].mxu1 %vm718_vm1, %v3783_v55 }
 0x182   : > { %3199 = vmatpush3.bf16.msra.mxu0 %v3435_v59  ;;  %3207 = vmatpush3.bf16.msra.mxu1 %v3436_v60 }
 0x183   : > { %3202 = vmatprep.mubr.msk.bf16.mxu0 %vm718_vm1, %v3785_v56  ;;  %3210 = vmatprep.mubr.msk.bf16.mxu1 %vm718_vm1, %v3785_v56 }
 0x184   : > { %3200 = vmatprep.subr.bf16.mxu0 %v3437_v61  ;;  %3208 = vmatprep.subr.bf16.mxu1 %v3438_v62 }
 0x186   : > { %3201 = vmatpush3.bf16.msra.mxu0 %v3437_v61  ;;  %3209 = vmatpush3.bf16.msra.mxu1 %v3438_v62 }
 0x187   : > { %3214 = vmatprep.subr.bf16.mxu0 %v3439_v63  ;;  %3222 = vmatprep.subr.bf16.mxu1 %v3440_v0 }
 0x189   : > { %3203 = vmatmul.mubr.msk.bf16.vlgmr.msra.gmra.mrb[8].mxu0 %vm718_vm1, %v3783_v55  ;;  %3211 = vmatmul.mubr.msk.bf16.vlgmr.msra.gmra.mrb[8].mxu1 %vm718_vm1, %v3783_v55 }
 0x18a   : > { %3215 = vmatpush3.bf16.msra.mxu0 %v3439_v63  ;;  %3218 = vmatprep.mubr.msk.bf16.mxu0 %vm718_vm1, %v3785_v56 }
 0x18b   : > { %3223 = vmatpush3.bf16.msra.mxu1 %v3440_v0  ;;  %3226 = vmatprep.mubr.msk.bf16.mxu1 %vm718_vm1, %v3785_v56 }
 0x18c   : > { %3216 = vmatprep.subr.bf16.mxu0 %v3441_v1  ;;  %3224 = vmatprep.subr.bf16.mxu1 %v3442_v2 }
 0x18e   : > { %3217 = vmatpush3.bf16.msra.mxu0 %v3441_v1 }
 0x18f   : > { %3225 = vmatpush3.bf16.msra.mxu1 %v3442_v2  ;;  %3230 = vmatprep.subr.bf16.mxu0 %v3443_v3 }
 0x190   : > { %3238 = vmatprep.subr.bf16.mxu1 %v3444_v4 }
 0x191   : > { %3219 = vmatmul.mubr.msk.bf16.vlgmr.msra.gmra.mrb[12].mxu0 %vm718_vm1, %v3783_v55 }
 0x192   : > { %3227 = vmatmul.mubr.msk.bf16.vlgmr.msra.gmra.mrb[12].mxu1 %vm718_vm1, %v3783_v55  ;;  %3231 = vmatpush3.bf16.msra.mxu0 %v3443_v3 }
 0x193   : > { %3234 = vmatprep.mubr.msk.bf16.mxu0 %vm718_vm1, %v3785_v56  ;;  %3239 = vmatpush3.bf16.msra.mxu1 %v3444_v4 }
 0x194   : > { %3242 = vmatprep.mubr.msk.bf16.mxu1 %vm718_vm1, %v3785_v56  ;;  %3232 = vmatprep.subr.bf16.mxu0 %v3445_v8 }
 0x195   : > { %3240 = vmatprep.subr.bf16.mxu1 %v3446_v9 }
 0x196   : > { %3233 = vmatpush3.bf16.msra.mxu0 %v3445_v8 }
 0x197   : > { %3241 = vmatpush3.bf16.msra.mxu1 %v3446_v9  ;;  %3246 = vmatprep.subr.bf16.mxu0 %v3447_v10 }
 0x198   : > { %3254 = vmatprep.subr.bf16.mxu1 %v3448_v11 }
 0x199   : > { %3235 = vmatmul.mubr.msk.bf16.vlgmr.msra.gmra.mrb[16].mxu0 %vm718_vm1, %v3783_v55 }
 0x19a   : > { %3243 = vmatmul.mubr.msk.bf16.vlgmr.msra.gmra.mrb[16].mxu1 %vm718_vm1, %v3783_v55  ;;  %3247 = vmatpush3.bf16.msra.mxu0 %v3447_v10 }
 0x19b   : > { %3250 = vmatprep.mubr.msk.bf16.mxu0 %vm718_vm1, %v3785_v56  ;;  %3255 = vmatpush3.bf16.msra.mxu1 %v3448_v11 }
 0x19c   : > { %3258 = vmatprep.mubr.msk.bf16.mxu1 %vm718_vm1, %v3785_v56  ;;  %3248 = vmatprep.subr.bf16.mxu0 %v3449_v12 }
 0x19d   : > { %3256 = vmatprep.subr.bf16.mxu1 %v3450_v13 }
 0x19e   : > { %3249 = vmatpush3.bf16.msra.mxu0 %v3449_v12 }
 0x19f   : > { %3257 = vmatpush3.bf16.msra.mxu1 %v3450_v13 }
 0x1a1   : > { %3251 = vmatmul.mubr.msk.bf16.vlgmr.msra.gmra.mrb[20].mxu0 %vm718_vm1, %v3783_v55 }
 0x1a2   : > { %3259 = vmatmul.mubr.msk.bf16.vlgmr.msra.gmra.mrb[20].mxu1 %vm718_vm1, %v3783_v55 }
 0x24c   : > { %v3853_v14 = vpop.f32.mrb[0].mxu0  ;;  %v3855_v15 = vpop.f32.mrb[0].mxu1 }
 0x24d   : > { %v883_v16 = vpop.f32.mrb[1].mxu0  ;;  %v943_v17 = vpop.f32.mrb[1].mxu1  ;;  %v1078_v3 = vpack.c.bf16 %v3853_v14, %v3853_v14  ;;  %v1080_v4 = vpack.c.bf16 %v3855_v15, %v3855_v15 }
 0x24e   : > { %v3173_v18 = vpop.f32.mrb[2].mxu0  ;;  %v3181_v19 = vpop.f32.mrb[2].mxu1 }
 0x24f   : > { %v886_v20 = vpop.f32.mrb[3].mxu0  ;;  %v946_v21 = vpop.f32.mrb[3].mxu1 }
 0x250   : > { %v1077_v22 = vpack.c.bf16 %v886_v20, %v883_v16  ;;  %v1079_v23 = vpack.c.bf16 %v946_v21, %v943_v17 }
 0x252   : > { %3266 = vmatprep.mubr.msk.bf16.mxu0 %vm1581_vm2, %v1077_v22  ;;  %3274 = vmatprep.mubr.msk.bf16.mxu1 %vm1581_vm2, %v1079_v23 }
 0x254   : > { %v3859_v24 = vpop.f32.mrb[4].mxu0  ;;  %v3861_v25 = vpop.f32.mrb[4].mxu1 }
 0x255   : > { %v3863_v26 = vpop.f32.mrb[5].mxu0  ;;  %v3865_v27 = vpop.f32.mrb[5].mxu1 }
 0x256   : > { %v3189_v28 = vpop.f32.mrb[6].mxu0  ;;  %v3197_v29 = vpop.f32.mrb[6].mxu1 }
 0x257   : > { %v1006_v30 = vpop.f32.mrb[7].mxu0  ;;  %v1066_v31 = vpop.f32.mrb[7].mxu1  ;;  %v1082_v29 = vpack.c.bf16 %v3859_v24, %v3859_v24 }
 0x258   : > { %v1081_v32 = vpack.c.bf16 %v1006_v30, %v3863_v26  ;;  %v1083_v33 = vpack.c.bf16 %v1066_v31, %v3865_v27  ;;  %v1084_v30 = vpack.c.bf16 %v3861_v25, %v3861_v25  ;;  %v1822_v25 = vlaneseq }
 0x25c   : > { %v3204_v34 = vpop.f32.mrb[8].mxu0  ;;  %v3212_v35 = vpop.f32.mrb[8].mxu1 }
 0x25d   : > { %v1131_v36 = vpop.f32.mrb[9].mxu0  ;;  %v1191_v37 = vpop.f32.mrb[9].mxu1  ;;  %v1326_v44 = vpack.c.bf16 %v3204_v34, %v3204_v34  ;;  %v1328_v45 = vpack.c.bf16 %v3212_v35, %v3212_v35  ;;  %v1823_v34 = vand.u32 127, %v1822_v25 }
 0x25e   : > { %v3205_v38 = vpop.f32.mrb[10].mxu0  ;;  %v3213_v39 = vpop.f32.mrb[10].mxu1 }
 0x25f   : > { %v1134_v40 = vpop.f32.mrb[11].mxu0  ;;  %v1194_v41 = vpop.f32.mrb[11].mxu1  ;;  %v1592_v58 = vsel %vm1581_vm2, %v1326_v44, 0  ;;  %v1652_v59 = vsel %vm1581_vm2, %v1328_v45, 0  ;;  %vm1824_vm4 = vcmp.ge.s32.totalorder %v1823_v34, 17 }
 0x260   : > { %v1325_v42 = vpack.c.bf16 %v1134_v40, %v1131_v36  ;;  %v1327_v43 = vpack.c.bf16 %v1194_v41, %v1191_v37 }
 0x262   : > { %v1589_v46 = vsel %vm1581_vm2, %v1325_v42, 0  ;;  %v1649_v47 = vsel %vm1581_vm2, %v1327_v43, 0  ;;  %3370 = vmatprep.subr.msk.bf16.mxu0 %vm1581_vm2, %v1325_v42  ;;  %3372 = vmatprep.subr.msk.bf16.mxu1 %vm1581_vm2, %v1327_v43 }
 0x263   : > { %3263 = vmatpush3.bf16.xpose.msra.mxu0 %v1589_v46  ;;  %3271 = vmatpush3.bf16.xpose.msra.mxu1 %v1649_v47 }
 0x264   : > { %v3220_v48 = vpop.f32.mrb[12].mxu0  ;;  %3371 = vmatprep.subr.msk.bf16.mxu0 %vm1581_vm2, %v1326_v44  ;;  %3373 = vmatprep.subr.msk.bf16.mxu1 %vm1581_vm2, %v1328_v45 }
 0x265   : > { %v3228_v49 = vpop.f32.mrb[12].mxu1  ;;  %v1251_v50 = vpop.f32.mrb[13].mxu0  ;;  %v1330_v12 = vpack.c.bf16 %v3220_v48, %v3220_v48 }
 0x266   : > { %v1311_v51 = vpop.f32.mrb[13].mxu1  ;;  %v3221_v52 = vpop.f32.mrb[14].mxu0  ;;  %v1332_v13 = vpack.c.bf16 %v3228_v49, %v3228_v49 }
 0x267   : > { %v3229_v53 = vpop.f32.mrb[14].mxu1  ;;  %v1254_v54 = vpop.f32.mrb[15].mxu0  ;;  %v1712_v27 = vsel %vm1581_vm2, %v1330_v12, 0 }
 0x268   : > { %v1329_v55 = vpack.c.bf16 %v1254_v54, %v1251_v50  ;;  %v1314_v56 = vpop.f32.mrb[15].mxu1  ;;  %v1772_v28 = vsel %vm1581_vm2, %v1332_v13, 0 }
 0x269   : > { %v1331_v57 = vpack.c.bf16 %v1314_v56, %v1311_v51 }
 0x26a   : > { %v1709_v11 = vsel %vm1581_vm2, %v1329_v55, 0 }
 0x26b   : > { %3265 = vmatpush3.bf16.xpose.msra.mxu0 %v1592_v58  ;;  %3273 = vmatpush3.bf16.xpose.msra.mxu1 %v1652_v59  ;;  %v1769_v16 = vsel %vm1581_vm2, %v1331_v57, 0 }
 0x26c   : > { %v3236_v60 = vpop.f32.mrb[16].mxu0  ;;  %3374 = vmatprep.subr.msk.bf16.mxu0 %vm1581_vm2, %v1329_v55  ;;  %3376 = vmatprep.subr.msk.bf16.mxu1 %vm1581_vm2, %v1331_v57 }
 0x26d   : > { %v3244_v61 = vpop.f32.mrb[16].mxu1  ;;  %v1379_v62 = vpop.f32.mrb[17].mxu0  ;;  %v1574_v31 = vpack.c.bf16 %v3236_v60, %v3236_v60 }
 0x26e   : > { %v1439_v63 = vpop.f32.mrb[17].mxu1  ;;  %v3237_v0 = vpop.f32.mrb[18].mxu0 }
 0x26f   : > { %v3245_v1 = vpop.f32.mrb[18].mxu1  ;;  %v1382_v2 = vpop.f32.mrb[19].mxu0 }
 0x270   : > { %v1573_v8 = vpack.c.bf16 %v1382_v2, %v1379_v62  ;;  %v1442_v9 = vpop.f32.mrb[19].mxu1 }
 0x271   : > { %v1575_v10 = vpack.c.bf16 %v1442_v9, %v1439_v63 }
 0x272   : > { %3267 = vmatmul.mubr.msk.bf16.vlgmr.msra.gmra.mrb[24].mxu0 %vm1581_vm2, %v1078_v3  ;;  %3275 = vmatmul.mubr.msk.bf16.vlgmr.msra.gmra.mrb[24].mxu1 %vm1581_vm2, %v1080_v4 }
 0x273   : > { %3279 = vmatpush3.bf16.xpose.msra.mxu0 %v1709_v11  ;;  %3282 = vmatprep.mubr.msk.bf16.mxu0 %vm1581_vm2, %v1081_v32  ;;  %v1576_v32 = vpack.c.bf16 %v3244_v61, %v3244_v61 }
 0x274   : > { %3287 = vmatpush3.bf16.xpose.msra.mxu1 %v1769_v16  ;;  %3290 = vmatprep.mubr.msk.bf16.mxu1 %vm1581_vm2, %v1083_v33  ;;  %v3889_v14 = vpop.f32.mrb[20].mxu0  ;;  %v1988_v33 = vsel %vm1986_vm3, %v1574_v31, 0 }
 0x275   : > { %v3891_v15 = vpop.f32.mrb[20].mxu1  ;;  %3375 = vmatprep.subr.msk.bf16.mxu0 %vm1581_vm2, %v1330_v12  ;;  %3377 = vmatprep.subr.msk.bf16.mxu1 %vm1581_vm2, %v1332_v13  ;;  %v1499_v17 = vpop.f32.mrb[21].mxu0  ;;  %v2045_v24 = vsel %vm1986_vm3, %v1576_v32, 0 }
 0x276   : > { %v1559_v18 = vpop.f32.mrb[21].mxu1  ;;  %v3253_v19 = vpop.f32.mrb[22].mxu0 }
 0x277   : > { %v3261_v20 = vpop.f32.mrb[22].mxu1  ;;  %v1502_v21 = vpop.f32.mrb[23].mxu0 }
 0x278   : > { %v3895_v22 = vpack.c.bf16 %v1502_v21, %v1499_v17  ;;  %v1562_v23 = vpop.f32.mrb[23].mxu1 }
 0x279   : > { %v3897_v26 = vpack.c.bf16 %v1562_v23, %v1559_v18 }
 0x27b   : > { %3281 = vmatpush3.bf16.xpose.msra.mxu0 %v1712_v27 }
 0x27c   : > { %3289 = vmatpush3.bf16.xpose.msra.mxu1 %v1772_v28  ;;  %3294 = vmatprep.subr.bf16.mxu0 %v1573_v8 }
 0x27d   : > { %3302 = vmatprep.subr.bf16.mxu1 %v1575_v10 }
 0x282   : > { %3283 = vmatmul.mubr.msk.bf16.vlgmr.msra.gmra.mrb[28].mxu0 %vm1581_vm2, %v1082_v29 }
 0x283   : > { %3291 = vmatmul.mubr.msk.bf16.vlgmr.msra.gmra.mrb[28].mxu1 %vm1581_vm2, %v1084_v30  ;;  %3295 = vmatpush3.bf16.msra.mxu0 %v1573_v8 }
 0x284   : > { %3303 = vmatpush3.bf16.msra.mxu1 %v1575_v10  ;;  %3378 = vmatprep.subr.msk.bf16.mxu0 %vm1986_vm3, %v1574_v31 }
 0x285   : > { %3379 = vmatprep.subr.msk.bf16.mxu1 %vm1986_vm3, %v1576_v32 }
 0x287   : > { %3297 = vmatpush3.bf16.msra.mxu0 %v1988_v33 }
 0x288   : > { %3305 = vmatpush3.bf16.msra.mxu1 %v2045_v24  ;;  %3310 = vmatprep.subr.bf16.mxu0 %v3895_v22 }
 0x289   : > { %3318 = vmatprep.subr.bf16.mxu1 %v3897_v26 }
 0x345   : > { %v3268_v35 = vpop.f32.mrb[24].mxu0  ;;  %v3276_v36 = vpop.f32.mrb[24].mxu1 }
 0x346   : > { %v1829_v37 = vsel %vm1824_vm4, -1e+30, %v3268_v35  ;;  %v1832_v38 = vsel %vm1824_vm4, -1e+30, %v3276_v36  ;;  %v1628_v39 = vpop.f32.mrb[25].mxu0  ;;  %v1688_v40 = vpop.f32.mrb[25].mxu1 }
 0x347   : > { %v3269_v41 = vpop.f32.mrb[26].mxu0  ;;  %v3277_v42 = vpop.f32.mrb[26].mxu1  ;;  %v1855_v43 = vsel %vm1839_vm5, %v1832_v38, -inf  ;;  %v1846_v45 = vsel %vm1839_vm5, %v1829_v37, -inf  ;;  %v1827_v47 = vsel %vm1824_vm4, -1e+30, %v1628_v39 }
 0x348   : > { %v1691_v44 = vpop.f32.mrb[27].mxu1  ;;  %v1631_v46 = vpop.f32.mrb[27].mxu0  ;;  %v1830_v48 = vsel %vm1824_vm4, -1e+30, %v1688_v40  ;;  %1856 = vmax.xlane.f32.xlu1 %v1855_v43  ;;  %1847 = vmax.xlane.f32.xlu0 %v1846_v45  ;;  %v1840_v50 = vsel %vm1839_vm5, %v1827_v47, -inf }
 0x349   : > { %v1849_v49 = vsel %vm1839_vm5, %v1830_v48, -inf  ;;  %v1831_v51 = vsel %vm1824_vm4, -1e+30, %v1691_v44  ;;  %v1828_v52 = vsel %vm1824_vm4, -1e+30, %v1631_v46 }
 0x34a   : > { %v1852_v53 = vsel %vm1839_vm5, %v1831_v51, -inf  ;;  %v1843_v54 = vsel %vm1839_vm5, %v1828_v52, -inf }
 0x34c   : > { %1850 = vmax.xlane.f32.xlu1 %v1849_v49  ;;  %1841 = vmax.xlane.f32.xlu0 %v1840_v50 }
 0x350   : > { %1853 = vmax.xlane.f32.xlu0 %v1852_v53  ;;  %1844 = vmax.xlane.f32.xlu1 %v1843_v54 }
 0x355   : > { %v3284_v55 = vpop.f32.mrb[28].mxu0 }
 0x356   : > { %v1835_v56 = vsel %vm1824_vm4, -1e+30, %v3284_v55  ;;  %v3292_v57 = vpop.f32.mrb[28].mxu1  ;;  %v1748_v58 = vpop.f32.mrb[29].mxu0 }
 0x357   : > { %v1808_v59 = vpop.f32.mrb[29].mxu1  ;;  %v3285_v60 = vpop.f32.mrb[30].mxu0  ;;  %v1864_v63 = vsel %vm1839_vm5, %v1835_v56, -inf  ;;  %v3929_v1 = vsel %vm1824_vm4, -1e+30, %v1748_v58 }
 0x358   : > { %v1836_v61 = vsel %vm1824_vm4, -1e+30, %v1808_v59  ;;  %v3293_v62 = vpop.f32.mrb[30].mxu1  ;;  %v1751_v0 = vpop.f32.mrb[31].mxu0  ;;  %1865 = vmax.xlane.f32.xlu0 %v1864_v63  ;;  %v1858_v8 = vsel %vm1839_vm5, %v3929_v1, -inf }
 0x359   : > { %v1811_v2 = vpop.f32.mrb[31].mxu1  ;;  %v1867_v3 = vsel %vm1839_vm5, %v1836_v61, -inf  ;;  %v3933_v4 = vsel %vm1824_vm4, -1e+30, %v1751_v0  ;;  %v3943_v11 = vsel %vm1824_vm4, -1e+30, %v3292_v57 }
 0x35a   : > { %1868 = vmax.xlane.f32.xlu1 %v1867_v3  ;;  %v3938_v9 = vsel %vm1824_vm4, -1e+30, %v1811_v2  ;;  %v1861_v10 = vsel %vm1839_vm5, %v3933_v4, -inf  ;;  %v1873_v13 = vsel %vm1839_vm5, %v3943_v11, -inf }
 0x35b   : > { %v1870_v12 = vsel %vm1839_vm5, %v3938_v9, -inf }
 0x35c   : > { %1859 = vmax.xlane.f32.xlu0 %v1858_v8 }
 0x35e   : > { %1862 = vmax.xlane.f32.xlu1 %v1861_v10 }
 0x360   : > { %1871 = vmax.xlane.f32.xlu0 %v1870_v12 }
 0x362   : > { %1874 = vmax.xlane.f32.xlu1 %v1873_v13 }
 0x3d5   : > { %v1857_v16 = vpop.xlane.xlu1 %1856  ;;  %v1848_v17 = vpop.xlane.xlu0 %1847 }
 0x3d6   : > { %v1881_v18 = vsub.f32 %v1832_v38, %v1857_v16  ;;  %v1878_v19 = vsub.f32 %v1829_v37, %v1848_v17 }
 0x3d8   : > { %v1898_v20 = vmul.f32 1.442695, %v1881_v18  ;;  %v1892_v21 = vmul.f32 1.442695, %v1878_v19 }
 0x3d9   : > { %v1851_v23 = vpop.xlane.xlu1 %1850  ;;  %v1842_v27 = vpop.xlane.xlu0 %1841 }
 0x3da   : > { %3463 = vpow2.f32 %v1898_v20  ;;  %v1879_v28 = vsub.f32 %v1830_v48, %v1851_v23  ;;  %v1876_v29 = vsub.f32 %v1827_v47, %v1842_v27 }
 0x3db   : > { %3465 = vpow2.f32 %v1892_v21 }
 0x3dc   : > { %v1894_v30 = vmul.f32 1.442695, %v1879_v28  ;;  %v1888_v31 = vmul.f32 1.442695, %v1876_v29 }
 0x3dd   : > { %v1854_v32 = vpop.xlane.xlu0 %1853  ;;  %v1845_v33 = vpop.xlane.xlu1 %1844 }
 0x3de   : > { %3467 = vpow2.f32 %v1894_v30  ;;  %v1880_v24 = vsub.f32 %v1831_v51, %v1854_v32  ;;  %v1877_v25 = vsub.f32 %v1828_v52, %v1845_v33 }
 0x3df   : > { %3469 = vpow2.f32 %v1888_v31 }
 0x3e0   : > { %v1896_v34 = vmul.f32 1.442695, %v1880_v24  ;;  %v1890_v35 = vmul.f32 1.442695, %v1877_v25 }
 0x3e2   : > { %3471 = vpow2.f32 %v1896_v34 }
 0x3e3   : > { %3473 = vpow2.f32 %v1890_v35 }
 0x3e4   : > { %v3949_v36 = vpop.eup %3463 }
 0x3e5   : > { %v3951_v37 = vpop.eup %3465  ;;  %v1866_v38 = vpop.xlane.xlu0 %1865  ;;  %v1927_v39 = vsel %vm1839_vm5, %v3949_v36, 0.0 }
 0x3e6   : > { %v1884_v40 = vsub.f32 %v1835_v56, %v1866_v38  ;;  %v1918_v42 = vsel %vm1839_vm5, %v3951_v37, 0.0  ;;  %1928 = vadd.xlane.f32.xlu1 %v1927_v39 }
 0x3e7   : > { %v1869_v41 = vpop.xlane.xlu1 %1868  ;;  %1919 = vadd.xlane.f32.xlu0 %v1918_v42 }
 0x3e8   : > { %v1885_v43 = vsub.f32 %v1836_v61, %v1869_v41  ;;  %v3957_v44 = vpop.eup %3467  ;;  %v1904_v45 = vmul.f32 1.442695, %v1884_v40 }
 0x3e9   : > { %v3959_v46 = vpop.eup %3469  ;;  %v1860_v48 = vpop.xlane.xlu0 %1859  ;;  %v1921_v49 = vsel %vm1839_vm5, %v3957_v44, 0.0 }
 0x3ea   : > { %v1906_v47 = vmul.f32 1.442695, %v1885_v43  ;;  %3475 = vpow2.f32 %v1904_v45  ;;  %v1882_v50 = vsub.f32 %v3929_v1, %v1860_v48  ;;  %v1912_v51 = vsel %vm1839_vm5, %v3959_v46, 0.0  ;;  %1922 = vadd.xlane.f32.xlu1 %v1921_v49 }
 0x3eb   : > { %v1863_v52 = vpop.xlane.xlu1 %1862  ;;  %1913 = vadd.xlane.f32.xlu0 %v1912_v51 }
 0x3ec   : > { %3477 = vpow2.f32 %v1906_v47  ;;  %v1883_v53 = vsub.f32 %v3933_v4, %v1863_v52  ;;  %v3967_v54 = vpop.eup %3471  ;;  %v1900_v55 = vmul.f32 1.442695, %v1882_v50 }
 0x3ed   : > { %v3969_v56 = vpop.eup %3473  ;;  %v1872_v58 = vpop.xlane.xlu0 %1871  ;;  %v1924_v59 = vsel %vm1839_vm5, %v3967_v54, 0.0 }
 0x3ee   : > { %v1902_v57 = vmul.f32 1.442695, %v1883_v53  ;;  %3479 = vpow2.f32 %v1900_v55  ;;  %v1886_v60 = vsub.f32 %v3938_v9, %v1872_v58  ;;  %v1915_v61 = vsel %vm1839_vm5, %v3969_v56, 0.0 }
 0x3ef   : > { %v1875_v62 = vpop.xlane.xlu1 %1874  ;;  %1925 = vadd.xlane.f32.xlu0 %v1924_v59  ;;  %1916 = vadd.xlane.f32.xlu1 %v1915_v61 }
 0x3f0   : > { %3481 = vpow2.f32 %v1902_v57  ;;  %v1887_v63 = vsub.f32 %v3943_v11, %v1875_v62  ;;  %v1908_v0 = vmul.f32 1.442695, %v1886_v60 }
 0x3f2   : > { %v1910_v1 = vmul.f32 1.442695, %v1887_v63  ;;  %3483 = vpow2.f32 %v1908_v0 }
 0x3f4   : > { %3485 = vpow2.f32 %v1910_v1  ;;  %v3977_v2 = vpop.eup %3475  ;;  %v827_v1 = vld [vmem:[%s4171_s29] sm:$0xf] }
 0x3f5   : > { %v1936_v4 = vsel %vm1839_vm5, %v3977_v2, 0.0 }
 0x3f6   : > { %v3979_v3 = vpop.eup %3477  ;;  %1937 = vadd.xlane.f32.xlu0 %v1936_v4 }
 0x3f7   : > { %v1939_v8 = vsel %vm1839_vm5, %v3979_v3, 0.0 }
 0x3f8   : > { %1940 = vadd.xlane.f32.xlu1 %v1939_v8  ;;  %v3985_v9 = vpop.eup %3479  ;;  %v829_v8 = vld [vmem:[%s4171_s29 + $0x8] sm:$0xf] }
 0x3f9   : > { %v1930_v11 = vsel %vm1839_vm5, %v3985_v9, 0.0 }
 0x3fa   : > { %v3987_v10 = vpop.eup %3481  ;;  %1931 = vadd.xlane.f32.xlu0 %v1930_v11 }
 0x3fb   : > { %v1933_v12 = vsel %vm1839_vm5, %v3987_v10, 0.0 }
 0x3fc   : > { %1934 = vadd.xlane.f32.xlu1 %v1933_v12  ;;  %v3993_v13 = vpop.eup %3483 }
 0x3fd   : > { %v1942_v17 = vsel %vm1839_vm5, %v3993_v13, 0.0 }
 0x3fe   : > { %v3995_v16 = vpop.eup %3485  ;;  %1943 = vadd.xlane.f32.xlu0 %v1942_v17 }
 0x3ff   : > { %v1945_v18 = vsel %vm1839_vm5, %v3995_v16, 0.0 }
 0x400   : > { %1946 = vadd.xlane.f32.xlu1 %v1945_v18 }
 0x473   : > { %v1929_v19 = vpop.xlane.xlu1 %1928 }
 0x474   : > { %v1920_v20 = vpop.xlane.xlu0 %1919  ;;  %3487 = vrcp.f32 %v1929_v19 }
 0x475   : > { %3489 = vrcp.f32 %v1920_v20 }
 0x477   : > { %v1923_v21 = vpop.xlane.xlu1 %1922 }
 0x478   : > { %v1914_v23 = vpop.xlane.xlu0 %1913  ;;  %3491 = vrcp.f32 %v1923_v21 }
 0x479   : > { %3493 = vrcp.f32 %v1914_v23 }
 0x47c   : > { %v1926_v27 = vpop.xlane.xlu0 %1925  ;;  %v1917_v28 = vpop.xlane.xlu1 %1916 }
 0x47d   : > { %3495 = vrcp.f32 %v1926_v27 }
 0x47e   : > { %3497 = vrcp.f32 %v1917_v28  ;;  %v3488_v29 = vpop.eup %3487 }
 0x47f   : > { %v3490_v31 = vpop.eup %3489  ;;  %v1965_v34 = vmul.f32 %v3488_v29, %v3949_v36  ;;  %v2349_v29 = vsel %vm1986_vm3, %v829_v8, 0 }
 0x480   : > { %v1962_v39 = vmul.f32 %v3490_v31, %v3951_v37 }
 0x481   : > { %v1975_v36 = vpack.c.bf16 %v1965_v34, %v1965_v34 }
 0x482   : > { %v3492_v33 = vpop.eup %3491  ;;  %v1973_v37 = vpack.c.bf16 %v1962_v39, %v1962_v39 }
 0x483   : > { %v1938_v30 = vpop.xlane.xlu0 %1937  ;;  %v3494_v24 = vpop.eup %3493  ;;  %v1963_v41 = vmul.f32 %v3492_v33, %v3957_v44  ;;  %v1580_v44 = vpack.c.bf16 %v3891_v15, %v3891_v15 }
 0x484   : > { %3499 = vrcp.f32 %v1938_v30  ;;  %v1960_v43 = vmul.f32 %v3494_v24, %v3959_v46  ;;  %v1578_v46 = vpack.c.bf16 %v3889_v14, %v3889_v14 }
 0x485   : > { %v1941_v32 = vpop.xlane.xlu1 %1940  ;;  %v2159_v15 = vsel %vm1986_vm3, %v1580_v44, 0 }
 0x486   : > { %v2102_v53 = vsel %vm1986_vm3, %v1578_v46, 0 }
 0x487   : > { %v3496_v25 = vpop.eup %3495  ;;  %v1932_v35 = vpop.xlane.xlu0 %1931 }
 0x488   : > { %v3498_v38 = vpop.eup %3497  ;;  %3501 = vrcp.f32 %v1932_v35  ;;  %v1964_v42 = vmul.f32 %v3496_v25, %v3967_v54 }
 0x489   : > { %v1935_v40 = vpop.xlane.xlu1 %1934  ;;  %v1961_v45 = vmul.f32 %v3498_v38, %v3969_v56 }
 0x48a   : > { %3503 = vrcp.f32 %v1935_v40  ;;  %v1974_v47 = vpack.c.bf16 %v1964_v42, %v1963_v41  ;;  %v3025_v42 = vld [vmem:[%s4172_s0] ss:$0 sm:$0xff] }
 0x48b   : > { %3505 = vrcp.f32 %v1941_v32  ;;  %v1944_v48 = vpop.xlane.xlu0 %1943  ;;  %v1972_v49 = vpack.c.bf16 %v1961_v45, %v1960_v43 }
 0x48c   : > { %3507 = vrcp.f32 %v1944_v48  ;;  %3306 = vmatprep.mubr.msk.bf16.mxu1 %vm1839_vm5, %v1974_v47 }
 0x48d   : > { %v1947_v50 = vpop.xlane.xlu1 %1946  ;;  %3298 = vmatprep.mubr.msk.bf16.mxu0 %vm1839_vm5, %v1972_v49  ;;  %3307 = vmatmul.mubr.msk.bf16.vlgmr.msra.gmra.mrb[32].mxu1 %vm1839_vm5, %v1975_v36 }
 0x48e   : > { %3509 = vrcp.f32 %v1947_v50  ;;  %3299 = vmatmul.mubr.msk.bf16.vlgmr.msra.gmra.mrb[32].mxu0 %vm1839_vm5, %v1973_v37  ;;  %3319 = vmatpush3.bf16.msra.mxu1 %v3897_v26  ;;  %v3500_v51 = vpop.eup %3499 }
 0x48f   : > { %3311 = vmatpush3.bf16.msra.mxu0 %v3895_v22  ;;  %3381 = vmatprep.subr.msk.bf16.mxu1 %vm1986_vm3, %v1580_v44  ;;  %v1968_v14 = vmul.f32 %v3500_v51, %v3977_v2  ;;  %v828_v2 = vld [vmem:[%s4171_s29 + $0x4] sm:$0xf] }
 0x490   : > { %3380 = vmatprep.subr.msk.bf16.mxu0 %vm1986_vm3, %v1578_v46  ;;  %v2287_v4 = vsel %vm1986_vm3, %v828_v2, 0 }
 0x491   : > { %v1977_v59 = vpack.c.bf16 %v1968_v14, %v1968_v14 }
 0x492   : > { %v3502_v52 = vpop.eup %3501  ;;  %3321 = vmatpush3.bf16.msra.mxu1 %v2159_v15 }
 0x493   : > { %3313 = vmatpush3.bf16.msra.mxu0 %v2102_v53  ;;  %v1966_v55 = vmul.f32 %v3502_v52, %v3985_v9  ;;  %3383 = vmatprep.subr.msk.bf16.mxu1 %vm1986_vm3, %v828_v2  ;;  %v830_v9 = vld [vmem:[%s4171_s29 + $0xc] sm:$0xf] }
 0x494   : > { %v3504_v54 = vpop.eup %3503  ;;  %3382 = vmatprep.subr.msk.bf16.mxu0 %vm1986_vm3, %v827_v1  ;;  %v2411_v27 = vsel %vm1986_vm3, %v830_v9, 0 }
 0x495   : > { %v3506_v26 = vpop.eup %3505  ;;  %v1967_v22 = vmul.f32 %v3504_v54, %v3987_v10 }
 0x496   : > { %v3508_v56 = vpop.eup %3507  ;;  %v1969_v60 = vmul.f32 %v3506_v26, %v3979_v3  ;;  %v2219_v3 = vsel %vm1986_vm3, %v827_v1, 0 }
 0x497   : > { %v1976_v57 = vpack.c.bf16 %v1967_v22, %v1966_v55  ;;  %v1970_v61 = vmul.f32 %v3508_v56, %v3993_v13 }
 0x498   : > { %v3510_v58 = vpop.eup %3509 }
 0x499   : > { %v1971_v62 = vmul.f32 %v3510_v58, %v3995_v16  ;;  %3314 = vmatprep.mubr.msk.bf16.mxu0 %vm1839_vm5, %v1976_v57  ;;  %v1978_v63 = vpack.c.bf16 %v1970_v61, %v1969_v60 }
 0x49a   : > { %3315 = vmatmul.mubr.msk.bf16.vlgmr.msra.gmra.mrb[36].mxu0 %vm1839_vm5, %v1977_v59 }
 0x49b   : > { %v1979_v0 = vpack.c.bf16 %v1971_v62, %v1971_v62  ;;  %3322 = vmatprep.mubr.msk.bf16.mxu1 %vm1839_vm5, %v1978_v63  ;;  %3327 = vmatpush3.bf16.msra.mxu0 %v2219_v3 }
 0x49c   : > { %3384 = vmatprep.subr.msk.bf16.mxu0 %vm1986_vm3, %v829_v8 }
 0x49d   : > { %3323 = vmatmul.mubr.msk.bf16.vlgmr.msra.gmra.mrb[36].mxu1 %vm1839_vm5, %v1979_v0 }
 0x49e   : > { %3333 = vmatpush3.bf16.msra.mxu1 %v2287_v4 }
 0x49f   : > { %3385 = vmatprep.subr.msk.bf16.mxu1 %vm1986_vm3, %v830_v9 }
 0x560   : > { %v3308_v10 = vpop.f32.mrb[32].mxu1 }
 0x561   : > { %v3300_v11 = vpop.f32.mrb[32].mxu0  ;;  %v2081_v12 = vpop.f32.mrb[33].mxu1  ;;  %v2279_v21 = vpack.c.bf16 %v3308_v10, %v3308_v10 }
 0x562   : > { %v2024_v13 = vpop.f32.mrb[33].mxu0  ;;  %v3309_v16 = vpop.f32.mrb[34].mxu1  ;;  %v2211_v28 = vpack.c.bf16 %v3300_v11, %v3300_v11 }
 0x563   : > { %v3301_v17 = vpop.f32.mrb[34].mxu0  ;;  %v2084_v18 = vpop.f32.mrb[35].mxu1 }
 0x564   : > { %v2027_v19 = vpop.f32.mrb[35].mxu0  ;;  %v2278_v20 = vpack.c.bf16 %v2084_v18, %v2081_v12 }
 0x565   : > { %v2210_v23 = vpack.c.bf16 %v2027_v19, %v2024_v13 }
 0x566   : > { %3334 = vmatprep.mubr.msk.bf16.mxu1 %vm1581_vm2, %v2278_v20 }
 0x567   : > { %3328 = vmatprep.mubr.msk.bf16.mxu0 %vm1581_vm2, %v2210_v23  ;;  %3335 = vmatmul.mubr.msk.bf16.vlgmr.msra.gmra.mrb[40].mxu1 %vm1581_vm2, %v2279_v21 }
 0x568   : > { %3329 = vmatmul.mubr.msk.bf16.vlgmr.msra.gmra.mrb[40].mxu0 %vm1581_vm2, %v2211_v28  ;;  %3345 = vmatpush3.bf16.msra.mxu1 %v2411_v27  ;;  %v3451_v28 = vld [vmem:[%s3722_s5] sm:$0xff]  }
 0x569   : > { %3339 = vmatpush3.bf16.msra.mxu0 %v2349_v29  ;;  %v3452_v29 = vld [vmem:[%s3722_s5 + $0x8] sm:$0xff]  }
 0x56a   : > { %3350 = vmatprep.subr.bf16.mxu0 %v3451_v28 }
 0x56d   : > { %v3316_v30 = vpop.f32.mrb[36].mxu0 }
 0x56e   : > { %v2138_v31 = vpop.f32.mrb[37].mxu0  ;;  %v2341_v35 = vpack.c.bf16 %v3316_v30, %v3316_v30 }
 0x56f   : > { %v3317_v32 = vpop.f32.mrb[38].mxu0 }
 0x570   : > { %v2141_v33 = vpop.f32.mrb[39].mxu0  ;;  %v3324_v24 = vpop.f32.mrb[36].mxu1 }
 0x571   : > { %v2340_v25 = vpack.c.bf16 %v2141_v33, %v2138_v31  ;;  %v2195_v34 = vpop.f32.mrb[37].mxu1  ;;  %v2403_v41 = vpack.c.bf16 %v3324_v24, %v3324_v24 }
 0x572   : > { %v3325_v38 = vpop.f32.mrb[38].mxu1 }
 0x573   : > { %v2198_v39 = vpop.f32.mrb[39].mxu1  ;;  %3340 = vmatprep.mubr.msk.bf16.mxu0 %vm1581_vm2, %v2340_v25 }
 0x574   : > { %v2402_v40 = vpack.c.bf16 %v2198_v39, %v2195_v34  ;;  %3341 = vmatmul.mubr.msk.bf16.vlgmr.msra.gmra.mrb[44].mxu0 %vm1581_vm2, %v2341_v35 }
 0x575   : > { %3351 = vmatpush3.bf16.msra.mxu0 %v3451_v28 }
 0x576   : > { %3346 = vmatprep.mubr.msk.bf16.mxu1 %vm1581_vm2, %v2402_v40  ;;  %3352 = vmatprep.subr.bf16.mxu0 %v3452_v29  ;;  %v3032_v40 = vld [vmem:[%s4173_s2] ss:$0 sm:$0xff] }
 0x577   : > { %3347 = vmatmul.mubr.msk.bf16.vlgmr.msra.gmra.mrb[44].mxu1 %vm1581_vm2, %v2403_v41 }
 0x579   : > { %3353 = vmatpush3.bf16.msra.mxu0 %v3452_v29 }
 0x63a   : > { %v3336_v43 = vpop.f32.mrb[40].mxu1 }
 0x63b   : > { %v3330_v45 = vpop.f32.mrb[40].mxu0  ;;  %v2323_v47 = vpop.f32.mrb[41].mxu1 }
 0x63c   : > { %v2277_v48 = vadd.f32 %v3330_v45, %v3025_v42  ;;  %v2255_v49 = vpop.f32.mrb[41].mxu0  ;;  %v3337_v36 = vpop.f32.mrb[42].mxu1 }
 0x63d   : > { %v2275_v37 = vadd.f32 %v3025_v42, %v2255_v49  ;;  %v3331_v50 = vpop.f32.mrb[42].mxu0  ;;  %v2326_v44 = vpop.f32.mrb[43].mxu1 }
 0x63e   : > { %v2339_v46 = vadd.f32 %v3336_v43, %v2277_v48  ;;  %v2258_v51 = vpop.f32.mrb[43].mxu0  ;;  %v3033_v48 = vld [vmem:[%s4174_s30] ss:$0 sm:$0xff] }
 0x63f   : > { %v2337_v15 = vadd.f32 %v2323_v47, %v2275_v37  ;;  %v2276_v52 = vadd.f32 %v3025_v42, %v2258_v51 }
 0x641   : > { %v2338_v53 = vadd.f32 %v2326_v44, %v2276_v52  ;;  %v3453_v52 = vld [vmem:[%s3736_s14] sm:$0xff]  }
 0x642   : > { %3358 = vmatprep.subr.bf16.mxu1 %v3453_v52 }
 0x643   : > { %3359 = vmatpush3.bf16.msra.mxu1 %v3453_v52 }
 0x647   : > { %v3342_v54 = vpop.f32.mrb[44].mxu0 }
 0x648   : > { %v2401_v14 = vadd.f32 %v3342_v54, %v2339_v46  ;;  %v2385_v55 = vpop.f32.mrb[45].mxu0  ;;  %v3455_v54 = vld [vmem:[%s3736_s14 + $0x10] sm:$0xff]  }
 0x649   : > { %v2399_v26 = vadd.f32 %v2385_v55, %v2337_v15  ;;  %v3343_v22 = vpop.f32.mrb[46].mxu0  ;;  %v3034_v55 = vld [vmem:[%s684_s6] ss:$0 sm:$0xff] }
 0x64a   : > { %v2388_v56 = vpop.f32.mrb[47].mxu0  ;;  %v3348_v57 = vpop.f32.mrb[44].mxu1 }
 0x64b   : > { %v2400_v58 = vadd.f32 %v2388_v56, %v2338_v53  ;;  %v2463_v59 = vadd.f32 %v3348_v57, %v2401_v14  ;;  %v2447_v60 = vpop.f32.mrb[45].mxu1  ;;  %v3454_v53 = vld [vmem:[%s3736_s14 + $0x8] sm:$0xff]   ;;  %v3456_v14 = vld [vmem:[%s3736_s14 + $0x18] sm:$0xff]  }
 0x64c   : > { %v2461_v61 = vadd.f32 %v2447_v60, %v2399_v26  ;;  %v3349_v62 = vpop.f32.mrb[46].mxu1  ;;  %3360 = vmatprep.subr.bf16.mxu1 %v3454_v53 }
 0x64d   : > { %v2450_v63 = vpop.f32.mrb[47].mxu1  ;;  %v4060_v2 = vadd.f32 %v2463_v59, %v3751_v6  ;;  %3361 = vmatpush3.bf16.msra.mxu1 %v3454_v53 }
 0x64e   : > { %v4057_v0 = vadd.f32 %v3749_v5, %v2461_v61  ;;  %v2462_v1 = vadd.f32 %v2450_v63, %v2400_v58  ;;  %3362 = vmatprep.subr.bf16.mxu1 %v3455_v54 }
 0x64f   : > { %v2475_v9 = vsel %vm718_vm1, %v4060_v2, 0.0 }
 0x650   : > { %v4063_v3 = vadd.f32 %v3753_v7, %v2462_v1  ;;  %v2469_v4 = vsel %vm718_vm1, %v4057_v0, 0.0 }
 0x651   : > { %2470 = vadd.xlane.f32.xlu0 %v2469_v4  ;;  %3363 = vmatpush3.bf16.msra.mxu1 %v3455_v54 }
 0x652   : > { %v2472_v8 = vsel %vm718_vm1, %v4063_v3, 0.0  ;;  %3364 = vmatprep.subr.bf16.mxu1 %v3456_v14 }
 0x653   : > { %2473 = vadd.xlane.f32.xlu1 %v2472_v8 }
 0x655   : > { %2476 = vadd.xlane.f32.xlu0 %v2475_v9  ;;  %3365 = vmatpush3.bf16.msra.mxu1 %v3456_v14 }
 0x6de   : > { %v2471_v5 = vpop.xlane.xlu0 %2470 }
 0x6df   : > { %v2478_v10 = vmul.f32 0.03125, %v2471_v5 }
 0x6e0   : > { %v2474_v11 = vpop.xlane.xlu1 %2473 }
 0x6e1   : > { %v2481_v6 = vsub.f32 %v4057_v0, %v2478_v10  ;;  %v2479_v7 = vmul.f32 0.03125, %v2474_v11 }
 0x6e2   : > { %v2477_v12 = vpop.xlane.xlu0 %2476 }
 0x6e3   : > { %v2482_v13 = vsub.f32 %v4063_v3, %v2479_v7  ;;  %v2480_v16 = vmul.f32 0.03125, %v2477_v12  ;;  %v2484_v17 = vmul.f32 %v2481_v6, %v2481_v6 }
 0x6e5   : > { %v2483_v18 = vsub.f32 %v4060_v2, %v2480_v16  ;;  %v2487_v19 = vsel %vm718_vm1, %v2484_v17, 0.0  ;;  %v2485_v20 = vmul.f32 %v2482_v13, %v2482_v13 }
 0x6e6   : > { %2488 = vadd.xlane.f32.xlu1 %v2487_v19  ;;  %v3039_v19 = vld [vmem:[%s692_s17] ss:$0 sm:$0xff] }
 0x6e7   : > { %v2490_v21 = vsel %vm718_vm1, %v2485_v20, 0.0  ;;  %v2486_v23 = vmul.f32 %v2483_v18, %v2483_v18 }
 0x6e8   : > { %2491 = vadd.xlane.f32.xlu0 %v2490_v21 }
 0x6e9   : > { %v2493_v27 = vsel %vm718_vm1, %v2486_v23, 0.0 }
 0x6ea   : > { %2494 = vadd.xlane.f32.xlu1 %v2493_v27 }
 0x773   : > { %v2489_v30 = vpop.xlane.xlu1 %2488 }
 0x774   : > { %v2496_v31 = vmul.f32 0.03125, %v2489_v30 }
 0x775   : > { %v2492_v32 = vpop.xlane.xlu0 %2491 }
 0x776   : > { %v2499_v33 = vadd.f32 1e-05, %v2496_v31  ;;  %v2497_v24 = vmul.f32 0.03125, %v2492_v32 }
 0x777   : > { %v2495_v25 = vpop.xlane.xlu1 %2494 }
 0x778   : > { %3511 = vrsqrt.f32 %v2499_v33  ;;  %v2500_v34 = vadd.f32 1e-05, %v2497_v24  ;;  %v2498_v35 = vmul.f32 0.03125, %v2495_v25 }
 0x77a   : > { %3513 = vrsqrt.f32 %v2500_v34  ;;  %v2501_v38 = vadd.f32 1e-05, %v2498_v35 }
 0x77c   : > { %3515 = vrsqrt.f32 %v2501_v38 }
 0x782   : > { %v3512_v39 = vpop.eup %3511 }
 0x783   : > { %v2505_v41 = vmul.f32 %v3512_v39, %v2481_v6 }
 0x784   : > { %v3514_v42 = vpop.eup %3513 }
 0x785   : > { %v2506_v43 = vmul.f32 %v3514_v42, %v2482_v13  ;;  %v2514_v45 = vmul.f32 %v3032_v40, %v2505_v41 }
 0x786   : > { %v3516_v47 = vpop.eup %3515 }
 0x787   : > { %v2507_v49 = vmul.f32 %v3516_v47, %v2483_v18  ;;  %v2515_v36 = vmul.f32 %v3032_v40, %v2506_v43  ;;  %v2523_v50 = vadd.f32 %v3033_v48, %v2514_v45 }
 0x789   : > { %v2516_v37 = vmul.f32 %v3032_v40, %v2507_v49  ;;  %v2524_v44 = vadd.f32 %v3033_v48, %v2515_v36 }
 0x78b   : > { %v2526_v46 = vpack.c.bf16 %v2524_v44, %v2523_v50  ;;  %v2525_v51 = vadd.f32 %v3033_v48, %v2516_v37 }
 0x78d   : > { %3354 = vmatprep.mubr.msk.bf16.mxu0 %vm718_vm1, %v2526_v46  ;;  %v2527_v15 = vpack.c.bf16 %v2525_v51, %v2525_v51 }
 0x78f   : > { %3355 = vmatmul.mubr.msk.bf16.vlgmr.msra.gmra.mrb[48].mxu0 %vm718_vm1, %v2527_v15 }
 0x862   : > { %v3356_v26 = vpop.f32.mrb[48].mxu0 }
 0x863   : > { %v2600_v22 = vadd.f32 %v3356_v26, %v3034_v55  ;;  %v2591_v56 = vpop.f32.mrb[49].mxu0 }
 0x864   : > { %v2592_v57 = vadd.f32 %v3034_v55, %v2591_v56  ;;  %v3357_v58 = vpop.f32.mrb[50].mxu0 }
 0x865   : > { %v2610_v59 = vmul.f32 0.70710677, %v2600_v22  ;;  %v2594_v60 = vpop.f32.mrb[51].mxu0  ;;  %v2607_v10 = vmul.f32 0.5, %v2600_v22 }
 0x866   : > { %v2608_v61 = vmul.f32 0.70710677, %v2592_v57  ;;  %v2595_v62 = vadd.f32 %v3034_v55, %v2594_v60  ;;  %v2605_v11 = vmul.f32 0.5, %v2592_v57 }
 0x867   : > { %3517 = verf.f32 %v2610_v59 }
 0x868   : > { %3519 = verf.f32 %v2608_v61  ;;  %v2609_v63 = vmul.f32 0.70710677, %v2595_v62  ;;  %v2606_v6 = vmul.f32 0.5, %v2595_v62 }
 0x86a   : > { %3521 = verf.f32 %v2609_v63 }
 0x871   : > { %v3518_v1 = vpop.eup %3517 }
 0x872   : > { %v3520_v4 = vpop.eup %3519  ;;  %v2616_v8 = vadd.f32 1.0, %v3518_v1 }
 0x873   : > { %v2614_v9 = vadd.f32 1.0, %v3520_v4 }
 0x874   : > { %v3522_v5 = vpop.eup %3521  ;;  %v2619_v12 = vmul.f32 %v2616_v8, %v2607_v10 }
 0x875   : > { %v2615_v7 = vadd.f32 1.0, %v3522_v5  ;;  %v2617_v13 = vmul.f32 %v2614_v9, %v2605_v11 }
 0x876   : > { %v2621_v18 = vpack.c.bf16 %v2619_v12, %v2619_v12 }
 0x877   : > { %v2618_v16 = vmul.f32 %v2615_v7, %v2606_v6 }
 0x879   : > { %v2620_v17 = vpack.c.bf16 %v2618_v16, %v2617_v13 }
 0x87b   : > { %3366 = vmatprep.mubr.msk.bf16.mxu1 %vm2661_vm6, %v2620_v17 }
 0x87c   : > { %3367 = vmatmul.mubr.msk.bf16.vlgmr.msra.gmra.mrb[48].mxu1 %vm2661_vm6, %v2621_v18 }
 0x94f   : > { %v3368_v20 = vpop.f32.mrb[48].mxu1 }
 0x950   : > { %v2711_v21 = vadd.f32 %v3368_v20, %v3039_v19  ;;  %v2702_v23 = vpop.f32.mrb[49].mxu1 }
 0x951   : > { %v2703_v27 = vadd.f32 %v3039_v19, %v2702_v23  ;;  %v3369_v28 = vpop.f32.mrb[50].mxu1 }
 0x952   : > { %v2718_v29 = vadd.f32 %v2711_v21, %v4060_v2  ;;  %v2705_v30 = vpop.f32.mrb[51].mxu1 }
 0x953   : > { %v2716_v31 = vadd.f32 %v2703_v27, %v4057_v0  ;;  %v2706_v32 = vadd.f32 %v3039_v19, %v2705_v30 }
 0x954   : > { %v3059_v33 = vpack.c.bf16 %v2718_v29, %v2718_v29 }
 0x955   : > { %v3057_v24 = vpack.c.bf16 %v2716_v31, %v2716_v31  ;;  %v2717_v25 = vadd.f32 %v2706_v32, %v4063_v3 }
 0x956   : > { %2735 = vst.msk [vmem:[%s3741_s16 + $0x8] sm:$0xf] %vm2732_vm7, %v3059_v33 }
 0x957   : > { %2733 = vst.msk [vmem:[%s3741_s16] sm:$0xf] %vm2732_vm7, %v3057_v24  ;;  %v3058_v34 = vpack.c.bf16 %v2717_v25, %v2717_v25 }
 0x959   : > { %2734 = vst.msk [vmem:[%s3741_s16 + $0x4] sm:$0xf] %vm2732_vm7, %v3058_v34 }
 0x95a PF: > { %s4175_s20 = sld [smem:[#allocation5_spill]]  ;;  %s4176_s29 = sld [smem:[#allocation3_spill]] }
 0x95b   : > { %s4177_s30 = sld [smem:[#allocation4_spill]]  ;;  %s4178_s15 = sld [smem:[#allocation6_spill]] }
 0x95c   : > { %s4179_s16 = sld [smem:[#allocation7_spill]] }
 0x960   : > { %s24_s17 = sadd.s32 1, %s4175_s20  }
 0x961   : > { %p21_p8 = scmp.ge.s32.totalorder %s24_s17, 6  }
 0x963   :  { %23 = sbr.rel (!%p21_p8) target bundleno = 8 (0x8), region = 149 }

</bundles_post_ra>
